<compile_context>
chip_gen: v7x
topology: tpu7x:2x2x1
jax: 0.10.0
libtpu: 0.0.40
codegen_flags: <defaults>
</compile_context>

<pallas_src>
import functools

import jax
import jax.numpy as jnp
from jax import lax
from jax.experimental import pallas as pl
from jax.experimental.pallas import tpu as pltpu


def _round_up(n, m):
    return ((n + m - 1) // m) * m


# ----------------------------------------------------------------------------
# Fused kernel (single invocation, no grid).
#   refs = [x, w_ih_0..L-1, w_hh_0..L-1, b_0..L-1, w_fc, b_fc, out,
#           gproj_scr, seq_scr]
#   x         : (S, Bp, I)   time-major, batch padded to Bp (f32 sublanes)
#   w_ih_l    : (in_l, 4H)   in_0 = I, in_{l>0} = H   (gate order i, f, g, o)
#   w_hh_l    : (H, 4H)
#   b_l       : (1, 4H)      b_ih + b_hh
#   w_fc      : (1, H)
#   b_fc      : (1, 1)
#   out       : (Bp, 1)
#   gproj_scr : (S, Bp, 4H)  hoisted input projection (+bias) for one layer
#   seq_scr   : (S, Bp, H)   hidden-state sequence carried between layers
# ----------------------------------------------------------------------------
def fused_lstm_kernel(*refs, L, S, Bp, H):
    x_ref = refs[0]
    wih = refs[1:1 + L]
    whh = refs[1 + L:1 + 2 * L]
    bias = refs[1 + 2 * L:1 + 3 * L]
    wfc_ref = refs[1 + 3 * L]
    bfc_ref = refs[2 + 3 * L]
    out_ref = refs[3 + 3 * L]
    gproj_scr = refs[4 + 3 * L]
    seq_scr = refs[5 + 3 * L]

    G = 4 * H
    # sigmoid-vs-tanh lane mask (gate 'g' = lanes [2H, 3H) takes tanh).
    # Built once and reused by every layer / timestep (no per-step broadcast).
    lane = lax.broadcasted_iota(jnp.int32, (Bp, G), 1)
    g_mask = (lane >= 2 * H) & (lane < 3 * H)

    unroll = True if S <= 8 else 8       # bound unroll for long sequences

    h_last = jnp.zeros((Bp, H), jnp.float32)
    for l in range(L):                   # static layer loop
        src = x_ref if l == 0 else seq_scr
        in_sz = src.shape[-1]
        # Hoisted input projection: one GEMM over all S timesteps, bias folded.
        src2d = src[...].reshape(S * Bp, in_sz)
        gproj = jnp.dot(src2d, wih[l][...],
                        preferred_element_type=jnp.float32) + bias[l][...]
        gproj_scr[...] = gproj.reshape(S, Bp, G)

        w_hh = whh[l][...]               # (H, 4H), resident across all steps
        write_seq = l < L - 1            # last layer only needs its final h

        def step(t, carry, _w=w_hh, _write=write_seq):
            h, c = carry
            # Serial critical path: one small (Bp,H)@(H,4H) matmul + cell math.
            gates = gproj_scr[t] + jnp.dot(h, _w,
                                           preferred_element_type=jnp.float32)
            act = jnp.where(g_mask, jnp.tanh(gates), jax.nn.sigmoid(gates))
            i_g = act[:, 0 * H:1 * H]
            f_g = act[:, 1 * H:2 * H]
            g_g = act[:, 2 * H:3 * H]
            o_g = act[:, 3 * H:4 * H]
            c_new = f_g * c + i_g * g_g
            h_new = o_g * jnp.tanh(c_new)
            if _write:
                seq_scr[t] = h_new
            return (h_new, c_new)

        zeros = jnp.zeros((Bp, H), jnp.float32)
        h_last, _ = lax.fori_loop(0, S, step, (zeros, zeros), unroll=unroll)

    # Final Linear(H, 1): VPU multiply + lane reduction (avoid an N=1 MXU pass).
    out = jnp.sum(h_last * wfc_ref[...], axis=-1, keepdims=True) + bfc_ref[...]
    out_ref[...] = out.astype(out_ref.dtype)


# ----------------------------------------------------------------------------
# One-time weight packing (NOT in the per-call path).
# ----------------------------------------------------------------------------
def pack_params(params, num_layers):
    """Transpose weights to (in, 4H), pre-sum the two biases.
    Gate column order i, f, g, o matches PyTorch's nn.LSTM layout."""
    H = params["w_hh_l0"].shape[1]
    wih, whh, bias = [], [], []
    for l in range(num_layers):
        wih.append(jnp.asarray(params[f"w_ih_l{l}"], jnp.float32).T)   # (in, 4H)
        whh.append(jnp.asarray(params[f"w_hh_l{l}"], jnp.float32).T)   # (H, 4H)
        bias.append((jnp.asarray(params[f"b_ih_l{l}"], jnp.float32)
                     + jnp.asarray(params[f"b_hh_l{l}"], jnp.float32)
                     ).reshape(1, 4 * H))
    w_fc = jnp.asarray(params["w_fc"], jnp.float32)                    # (1, H)
    b_fc = jnp.asarray(params["b_fc"], jnp.float32).reshape(1, 1)
    return tuple(wih + whh + bias + [w_fc, b_fc])


# ----------------------------------------------------------------------------
# Full model forward (mirrors the PyTorch module, batch-first input).
# ----------------------------------------------------------------------------
@functools.partial(jax.jit, static_argnames=("num_layers",))
def lstm_model_forward(x_bsi, packed, num_layers):
    B, S, I = x_bsi.shape
    H = packed[num_layers].shape[0]        # w_hh_l0 (transposed) is (H, 4H)
    Bp = _round_up(max(B, 8), 8)           # pad batch to f32 sublane count

    x = jnp.transpose(x_bsi, (1, 0, 2)).astype(jnp.float32)   # (S, B, I)
    x_pad = jnp.zeros((S, Bp, I), jnp.float32).at[:, :B, :].set(x)

    kernel = functools.partial(fused_lstm_kernel, L=num_layers, S=S, Bp=Bp, H=H)
    out_pad = pl.pallas_call(
        kernel,
        out_shape=jax.ShapeDtypeStruct((Bp, 1), jnp.float32),
        scratch_shapes=[pltpu.VMEM((S, Bp, 4 * H), jnp.float32),   # x-gates
                        pltpu.VMEM((S, Bp, H), jnp.float32)],      # layer outs
        # Explicit VMEM budget; everything here is well under 1 MiB and 16 MiB
        # is within every generation's default scoped limit.
        compiler_params=pltpu.CompilerParams(vmem_limit_bytes=16 * 1024 * 1024),
    )(x_pad, *packed)
    return out_pad[:B]


# ----------------------------------------------------------------------------
# Pure-JAX reference (correctness check only).
# ----------------------------------------------------------------------------
def lstm_model_reference(x_bsi, params, num_layers):
    B, S, _ = x_bsi.shape
    x = x_bsi
    for l in range(num_layers):
        H = params[f"w_hh_l{l}"].shape[1]
        w_ih, w_hh = params[f"w_ih_l{l}"], params[f"w_hh_l{l}"]
        b = params[f"b_ih_l{l}"] + params[f"b_hh_l{l}"]
        h = jnp.zeros((B, H), jnp.float32)
        c = jnp.zeros((B, H), jnp.float32)
        outs = []
        for t in range(S):
            gates = x[:, t, :] @ w_ih.T + h @ w_hh.T + b
            i_g = jax.nn.sigmoid(gates[:, 0 * H:1 * H])
            f_g = jax.nn.sigmoid(gates[:, 1 * H:2 * H])
            g_g = jnp.tanh(gates[:, 2 * H:3 * H])
            o_g = jax.nn.sigmoid(gates[:, 3 * H:4 * H])
            c = f_g * c + i_g * g_g
            h = o_g * jnp.tanh(c)
            outs.append(h)
        x = jnp.stack(outs, axis=1)  # (B, S, H)
    return x[:, -1, :] @ params["w_fc"].T + params["b_fc"]


def init_params(key, input_size, hidden_size, num_layers):
    """Deterministic init mimicking PyTorch defaults: U(-1/sqrt(H), 1/sqrt(H))."""
    params = {}
    k_lstm = 1.0 / jnp.sqrt(hidden_size)
    in_sz = input_size
    for l in range(num_layers):
        key, k1, k2, k3, k4 = jax.random.split(key, 5)
        params[f"w_ih_l{l}"] = jax.random.uniform(
            k1, (4 * hidden_size, in_sz), jnp.float32, -k_lstm, k_lstm)
        params[f"w_hh_l{l}"] = jax.random.uniform(
            k2, (4 * hidden_size, hidden_size), jnp.float32, -k_lstm, k_lstm)
        params[f"b_ih_l{l}"] = jax.random.uniform(
            k3, (4 * hidden_size,), jnp.float32, -k_lstm, k_lstm)
        params[f"b_hh_l{l}"] = jax.random.uniform(
            k4, (4 * hidden_size,), jnp.float32, -k_lstm, k_lstm)
        in_sz = hidden_size
    key, k5, k6 = jax.random.split(key, 3)
    k_fc = 1.0 / jnp.sqrt(hidden_size)
    params["w_fc"] = jax.random.uniform(k5, (1, hidden_size), jnp.float32,
                                        -k_fc, k_fc)
    params["b_fc"] = jax.random.uniform(k6, (1,), jnp.float32, -k_fc, k_fc)
    return params


if __name__ == "__main__":
    batch, seq, input_size, hidden_size, num_layers = 2, 8, 16, 32, 2

    key = jax.random.PRNGKey(0)
    key, kx, kp = jax.random.split(key, 3)
    x = jax.random.normal(kx, (batch, seq, input_size), jnp.float32)
    params = init_params(kp, input_size, hidden_size, num_layers)

    packed = pack_params(params, num_layers)       # one-time packing
    out = lstm_model_forward(x, packed, num_layers)
    out = jax.block_until_ready(out)
    assert out.shape == (batch, 1), out.shape

    ref = lstm_model_reference(x, params, num_layers)
    assert jnp.allclose(out, ref, atol=1e-3, rtol=1e-3), (out, ref)

    print("KERNEL_OK")
</pallas_src>

<mosaic_0001>
module attributes {stable_mosaic.version = 11 : i64} {
  func.func @fused_lstm_kernel(%arg0: memref<8x8x16xf32, #tpu.memory_space<vmem>>, %arg1: memref<16x128xf32, #tpu.memory_space<vmem>>, %arg2: memref<32x128xf32, #tpu.memory_space<vmem>>, %arg3: memref<32x128xf32, #tpu.memory_space<vmem>>, %arg4: memref<32x128xf32, #tpu.memory_space<vmem>>, %arg5: memref<1x128xf32, #tpu.memory_space<vmem>>, %arg6: memref<1x128xf32, #tpu.memory_space<vmem>>, %arg7: memref<1x32xf32, #tpu.memory_space<vmem>>, %arg8: memref<1x1xf32, #tpu.memory_space<vmem>>, %arg9: memref<8x1xf32, #tpu.memory_space<vmem>>, %arg10: memref<8x8x128xf32, #tpu.memory_space<vmem>>, %arg11: memref<8x8x32xf32, #tpu.memory_space<vmem>>) attributes {dimension_semantics = [], scalar_prefetch = 0 : i64, scratch_operands = 2 : i64, tpu.core_type = #tpu.core_type<tc>} {
    %0 = tpu.iota {dimensions = array<i32: 1>} : vector<8x128xi32>
    %c64_i32 = arith.constant 64 : i32
    %1 = vector.broadcast %c64_i32 : i32 to vector<8x128xi32>
    %2 = arith.cmpi sge, %0, %1 : vector<8x128xi32>
    %c96_i32 = arith.constant 96 : i32
    %3 = vector.broadcast %c96_i32 : i32 to vector<8x128xi32>
    %4 = arith.cmpi slt, %0, %3 : vector<8x128xi32>
    %5 = arith.andi %2, %4 : vector<8x128xi1>
    %c0 = arith.constant 0 : index
    %c0_0 = arith.constant 0 : index
    %c0_1 = arith.constant 0 : index
    %6 = vector.load %arg0[%c0, %c0_0, %c0_1] : memref<8x8x16xf32, #tpu.memory_space<vmem>>, vector<8x8x16xf32>
    %7 = vector.shape_cast %6 : vector<8x8x16xf32> to vector<64x16xf32>
    %c0_2 = arith.constant 0 : index
    %c0_3 = arith.constant 0 : index
    %8 = vector.load %arg1[%c0_2, %c0_3] : memref<16x128xf32, #tpu.memory_space<vmem>>, vector<16x128xf32>
    %cst = arith.constant dense<0.000000e+00> : vector<64x128xf32>
    %9 = tpu.matmul %7, %8, %cst {dimension_numbers = #tpu.dot_dimension_numbers<[1], [0], [0], [1], [0, 0, 1, 1], [], []>} : vector<64x16xf32>, vector<16x128xf32>, vector<64x128xf32> -> vector<64x128xf32>
    %c0_4 = arith.constant 0 : index
    %c0_5 = arith.constant 0 : index
    %10 = vector.load %arg5[%c0_4, %c0_5] : memref<1x128xf32, #tpu.memory_space<vmem>>, vector<1x128xf32>
    %11 = vector.broadcast %10 : vector<1x128xf32> to vector<64x128xf32>
    %12 = arith.addf %9, %11 : vector<64x128xf32>
    %13 = vector.shape_cast %12 : vector<64x128xf32> to vector<8x8x128xf32>
    %c0_6 = arith.constant 0 : index
    %c0_7 = arith.constant 0 : index
    %c0_8 = arith.constant 0 : index
    %14 = vector.load %arg10[%c0_6, %c0_7, %c0_8] : memref<8x8x128xf32, #tpu.memory_space<vmem>>, vector<8x8x128xf32>
    tpu.vector_store %arg10[%c0_6, %c0_7, %c0_8], %13 {strides = array<i32>} : memref<8x8x128xf32, #tpu.memory_space<vmem>>, vector<8x8x128xf32>,
    %c0_9 = arith.constant 0 : index
    %c0_10 = arith.constant 0 : index
    %15 = vector.load %arg3[%c0_9, %c0_10] : memref<32x128xf32, #tpu.memory_space<vmem>>, vector<32x128xf32>
    %cst_11 = arith.constant 0.000000e+00 : f32
    %16 = vector.broadcast %cst_11 : f32 to vector<8x32xf32>
    %c0_i32 = arith.constant 0 : i32
    %17 = arith.index_cast %c0_i32 : i32 to index
    %c0_12 = arith.constant 0 : index
    %c0_13 = arith.constant 0 : index
    %18 = vector.load %arg10[%17, %c0_12, %c0_13] : memref<8x8x128xf32, #tpu.memory_space<vmem>>, vector<1x8x128xf32>
    %19 = vector.shape_cast %18 : vector<1x8x128xf32> to vector<8x128xf32>
    %cst_14 = arith.constant dense<0.000000e+00> : vector<8x128xf32>
    %20 = tpu.matmul %16, %15, %cst_14 {dimension_numbers = #tpu.dot_dimension_numbers<[1], [0], [0], [1], [0, 0, 1, 1], [], []>} : vector<8x32xf32>, vector<32x128xf32>, vector<8x128xf32> -> vector<8x128xf32>
    %21 = arith.addf %19, %20 : vector<8x128xf32>
    %22 = math.tanh %21 : vector<8x128xf32>
    %23 = arith.negf %21 : vector<8x128xf32>
    %24 = math.exp %23 : vector<8x128xf32>
    %cst_15 = arith.constant 1.000000e+00 : f32
    %25 = vector.broadcast %cst_15 : f32 to vector<8x128xf32>
    %26 = arith.addf %25, %24 : vector<8x128xf32>
    %27 = arith.divf %25, %26 : vector<8x128xf32>
    %28 = arith.select %5, %22, %27 : vector<8x128xi1>, vector<8x128xf32>
    %29 = vector.extract_strided_slice %28 {offsets = [0, 0], sizes = [8, 32], strides = [1, 1]} : vector<8x128xf32> to vector<8x32xf32>
    %30 = vector.extract_strided_slice %28 {offsets = [0, 32], sizes = [8, 32], strides = [1, 1]} : vector<8x128xf32> to vector<8x32xf32>
    %31 = vector.extract_strided_slice %28 {offsets = [0, 64], sizes = [8, 32], strides = [1, 1]} : vector<8x128xf32> to vector<8x32xf32>
    %32 = vector.extract_strided_slice %28 {offsets = [0, 96], sizes = [8, 32], strides = [1, 1]} : vector<8x128xf32> to vector<8x32xf32>
    %33 = arith.mulf %30, %16 : vector<8x32xf32>
    %34 = arith.mulf %29, %31 : vector<8x32xf32>
    %35 = arith.addf %33, %34 : vector<8x32xf32>
    %36 = math.tanh %35 : vector<8x32xf32>
    %37 = arith.mulf %32, %36 : vector<8x32xf32>
    %38 = arith.index_cast %c0_i32 : i32 to index
    %c0_16 = arith.constant 0 : index
    %c0_17 = arith.constant 0 : index
    %39 = vector.load %arg11[%38, %c0_16, %c0_17] : memref<8x8x32xf32, #tpu.memory_space<vmem>>, vector<1x8x32xf32>
    %40 = vector.shape_cast %39 : vector<1x8x32xf32> to vector<8x32xf32>
    %41 = vector.shape_cast %37 : vector<8x32xf32> to vector<1x8x32xf32>
    tpu.vector_store %arg11[%38, %c0_16, %c0_17], %41 {strides = array<i32>} : memref<8x8x32xf32, #tpu.memory_space<vmem>>, vector<1x8x32xf32>,
    %c1_i32 = arith.constant 1 : i32
    %42 = arith.index_cast %c1_i32 : i32 to index
    %c0_18 = arith.constant 0 : index
    %c0_19 = arith.constant 0 : index
    %43 = vector.load %arg10[%42, %c0_18, %c0_19] : memref<8x8x128xf32, #tpu.memory_space<vmem>>, vector<1x8x128xf32>
    %44 = vector.shape_cast %43 : vector<1x8x128xf32> to vector<8x128xf32>
    %cst_20 = arith.constant dense<0.000000e+00> : vector<8x128xf32>
    %45 = tpu.matmul %37, %15, %cst_20 {dimension_numbers = #tpu.dot_dimension_numbers<[1], [0], [0], [1], [0, 0, 1, 1], [], []>} : vector<8x32xf32>, vector<32x128xf32>, vector<8x128xf32> -> vector<8x128xf32>
    %46 = arith.addf %44, %45 : vector<8x128xf32>
    %47 = math.tanh %46 : vector<8x128xf32>
    %48 = arith.negf %46 : vector<8x128xf32>
    %49 = math.exp %48 : vector<8x128xf32>
    %cst_21 = arith.constant 1.000000e+00 : f32
    %50 = vector.broadcast %cst_21 : f32 to vector<8x128xf32>
    %51 = arith.addf %50, %49 : vector<8x128xf32>
    %52 = arith.divf %50, %51 : vector<8x128xf32>
    %53 = arith.select %5, %47, %52 : vector<8x128xi1>, vector<8x128xf32>
    %54 = vector.extract_strided_slice %53 {offsets = [0, 0], sizes = [8, 32], strides = [1, 1]} : vector<8x128xf32> to vector<8x32xf32>
    %55 = vector.extract_strided_slice %53 {offsets = [0, 32], sizes = [8, 32], strides = [1, 1]} : vector<8x128xf32> to vector<8x32xf32>
    %56 = vector.extract_strided_slice %53 {offsets = [0, 64], sizes = [8, 32], strides = [1, 1]} : vector<8x128xf32> to vector<8x32xf32>
    %57 = vector.extract_strided_slice %53 {offsets = [0, 96], sizes = [8, 32], strides = [1, 1]} : vector<8x128xf32> to vector<8x32xf32>
    %58 = arith.mulf %55, %35 : vector<8x32xf32>
    %59 = arith.mulf %54, %56 : vector<8x32xf32>
    %60 = arith.addf %58, %59 : vector<8x32xf32>
    %61 = math.tanh %60 : vector<8x32xf32>
    %62 = arith.mulf %57, %61 : vector<8x32xf32>
    %63 = arith.index_cast %c1_i32 : i32 to index
    %c0_22 = arith.constant 0 : index
    %c0_23 = arith.constant 0 : index
    %64 = vector.load %arg11[%63, %c0_22, %c0_23] : memref<8x8x32xf32, #tpu.memory_space<vmem>>, vector<1x8x32xf32>
    %65 = vector.shape_cast %64 : vector<1x8x32xf32> to vector<8x32xf32>
    %66 = vector.shape_cast %62 : vector<8x32xf32> to vector<1x8x32xf32>
    tpu.vector_store %arg11[%63, %c0_22, %c0_23], %66 {strides = array<i32>} : memref<8x8x32xf32, #tpu.memory_space<vmem>>, vector<1x8x32xf32>,
    %c2_i32 = arith.constant 2 : i32
    %67 = arith.index_cast %c2_i32 : i32 to index
    %c0_24 = arith.constant 0 : index
    %c0_25 = arith.constant 0 : index
    %68 = vector.load %arg10[%67, %c0_24, %c0_25] : memref<8x8x128xf32, #tpu.memory_space<vmem>>, vector<1x8x128xf32>
    %69 = vector.shape_cast %68 : vector<1x8x128xf32> to vector<8x128xf32>
    %cst_26 = arith.constant dense<0.000000e+00> : vector<8x128xf32>
    %70 = tpu.matmul %62, %15, %cst_26 {dimension_numbers = #tpu.dot_dimension_numbers<[1], [0], [0], [1], [0, 0, 1, 1], [], []>} : vector<8x32xf32>, vector<32x128xf32>, vector<8x128xf32> -> vector<8x128xf32>
    %71 = arith.addf %69, %70 : vector<8x128xf32>
    %72 = math.tanh %71 : vector<8x128xf32>
    %73 = arith.negf %71 : vector<8x128xf32>
    %74 = math.exp %73 : vector<8x128xf32>
    %cst_27 = arith.constant 1.000000e+00 : f32
    %75 = vector.broadcast %cst_27 : f32 to vector<8x128xf32>
    %76 = arith.addf %75, %74 : vector<8x128xf32>
    %77 = arith.divf %75, %76 : vector<8x128xf32>
    %78 = arith.select %5, %72, %77 : vector<8x128xi1>, vector<8x128xf32>
    %79 = vector.extract_strided_slice %78 {offsets = [0, 0], sizes = [8, 32], strides = [1, 1]} : vector<8x128xf32> to vector<8x32xf32>
    %80 = vector.extract_strided_slice %78 {offsets = [0, 32], sizes = [8, 32], strides = [1, 1]} : vector<8x128xf32> to vector<8x32xf32>
    %81 = vector.extract_strided_slice %78 {offsets = [0, 64], sizes = [8, 32], strides = [1, 1]} : vector<8x128xf32> to vector<8x32xf32>
    %82 = vector.extract_strided_slice %78 {offsets = [0, 96], sizes = [8, 32], strides = [1, 1]} : vector<8x128xf32> to vector<8x32xf32>
    %83 = arith.mulf %80, %60 : vector<8x32xf32>
    %84 = arith.mulf %79, %81 : vector<8x32xf32>
    %85 = arith.addf %83, %84 : vector<8x32xf32>
    %86 = math.tanh %85 : vector<8x32xf32>
    %87 = arith.mulf %82, %86 : vector<8x32xf32>
    %88 = arith.index_cast %c2_i32 : i32 to index
    %c0_28 = arith.constant 0 : index
    %c0_29 = arith.constant 0 : index
    %89 = vector.load %arg11[%88, %c0_28, %c0_29] : memref<8x8x32xf32, #tpu.memory_space<vmem>>, vector<1x8x32xf32>
    %90 = vector.shape_cast %89 : vector<1x8x32xf32> to vector<8x32xf32>
    %91 = vector.shape_cast %87 : vector<8x32xf32> to vector<1x8x32xf32>
    tpu.vector_store %arg11[%88, %c0_28, %c0_29], %91 {strides = array<i32>} : memref<8x8x32xf32, #tpu.memory_space<vmem>>, vector<1x8x32xf32>,
    %c3_i32 = arith.constant 3 : i32
    %92 = arith.index_cast %c3_i32 : i32 to index
    %c0_30 = arith.constant 0 : index
    %c0_31 = arith.constant 0 : index
    %93 = vector.load %arg10[%92, %c0_30, %c0_31] : memref<8x8x128xf32, #tpu.memory_space<vmem>>, vector<1x8x128xf32>
    %94 = vector.shape_cast %93 : vector<1x8x128xf32> to vector<8x128xf32>
    %cst_32 = arith.constant dense<0.000000e+00> : vector<8x128xf32>
    %95 = tpu.matmul %87, %15, %cst_32 {dimension_numbers = #tpu.dot_dimension_numbers<[1], [0], [0], [1], [0, 0, 1, 1], [], []>} : vector<8x32xf32>, vector<32x128xf32>, vector<8x128xf32> -> vector<8x128xf32>
    %96 = arith.addf %94, %95 : vector<8x128xf32>
    %97 = math.tanh %96 : vector<8x128xf32>
    %98 = arith.negf %96 : vector<8x128xf32>
    %99 = math.exp %98 : vector<8x128xf32>
    %cst_33 = arith.constant 1.000000e+00 : f32
    %100 = vector.broadcast %cst_33 : f32 to vector<8x128xf32>
    %101 = arith.addf %100, %99 : vector<8x128xf32>
    %102 = arith.divf %100, %101 : vector<8x128xf32>
    %103 = arith.select %5, %97, %102 : vector<8x128xi1>, vector<8x128xf32>
    %104 = vector.extract_strided_slice %103 {offsets = [0, 0], sizes = [8, 32], strides = [1, 1]} : vector<8x128xf32> to vector<8x32xf32>
    %105 = vector.extract_strided_slice %103 {offsets = [0, 32], sizes = [8, 32], strides = [1, 1]} : vector<8x128xf32> to vector<8x32xf32>
    %106 = vector.extract_strided_slice %103 {offsets = [0, 64], sizes = [8, 32], strides = [1, 1]} : vector<8x128xf32> to vector<8x32xf32>
    %107 = vector.extract_strided_slice %103 {offsets = [0, 96], sizes = [8, 32], strides = [1, 1]} : vector<8x128xf32> to vector<8x32xf32>
    %108 = arith.mulf %105, %85 : vector<8x32xf32>
    %109 = arith.mulf %104, %106 : vector<8x32xf32>
    %110 = arith.addf %108, %109 : vector<8x32xf32>
    %111 = math.tanh %110 : vector<8x32xf32>
    %112 = arith.mulf %107, %111 : vector<8x32xf32>
    %113 = arith.index_cast %c3_i32 : i32 to index
    %c0_34 = arith.constant 0 : index
    %c0_35 = arith.constant 0 : index
    %114 = vector.load %arg11[%113, %c0_34, %c0_35] : memref<8x8x32xf32, #tpu.memory_space<vmem>>, vector<1x8x32xf32>
    %115 = vector.shape_cast %114 : vector<1x8x32xf32> to vector<8x32xf32>
    %116 = vector.shape_cast %112 : vector<8x32xf32> to vector<1x8x32xf32>
    tpu.vector_store %arg11[%113, %c0_34, %c0_35], %116 {strides = array<i32>} : memref<8x8x32xf32, #tpu.memory_space<vmem>>, vector<1x8x32xf32>,
    %c4_i32 = arith.constant 4 : i32
    %117 = arith.index_cast %c4_i32 : i32 to index
    %c0_36 = arith.constant 0 : index
    %c0_37 = arith.constant 0 : index
    %118 = vector.load %arg10[%117, %c0_36, %c0_37] : memref<8x8x128xf32, #tpu.memory_space<vmem>>, vector<1x8x128xf32>
    %119 = vector.shape_cast %118 : vector<1x8x128xf32> to vector<8x128xf32>
    %cst_38 = arith.constant dense<0.000000e+00> : vector<8x128xf32>
    %120 = tpu.matmul %112, %15, %cst_38 {dimension_numbers = #tpu.dot_dimension_numbers<[1], [0], [0], [1], [0, 0, 1, 1], [], []>} : vector<8x32xf32>, vector<32x128xf32>, vector<8x128xf32> -> vector<8x128xf32>
    %121 = arith.addf %119, %120 : vector<8x128xf32>
    %122 = math.tanh %121 : vector<8x128xf32>
    %123 = arith.negf %121 : vector<8x128xf32>
    %124 = math.exp %123 : vector<8x128xf32>
    %cst_39 = arith.constant 1.000000e+00 : f32
    %125 = vector.broadcast %cst_39 : f32 to vector<8x128xf32>
    %126 = arith.addf %125, %124 : vector<8x128xf32>
    %127 = arith.divf %125, %126 : vector<8x128xf32>
    %128 = arith.select %5, %122, %127 : vector<8x128xi1>, vector<8x128xf32>
    %129 = vector.extract_strided_slice %128 {offsets = [0, 0], sizes = [8, 32], strides = [1, 1]} : vector<8x128xf32> to vector<8x32xf32>
    %130 = vector.extract_strided_slice %128 {offsets = [0, 32], sizes = [8, 32], strides = [1, 1]} : vector<8x128xf32> to vector<8x32xf32>
    %131 = vector.extract_strided_slice %128 {offsets = [0, 64], sizes = [8, 32], strides = [1, 1]} : vector<8x128xf32> to vector<8x32xf32>
    %132 = vector.extract_strided_slice %128 {offsets = [0, 96], sizes = [8, 32], strides = [1, 1]} : vector<8x128xf32> to vector<8x32xf32>
    %133 = arith.mulf %130, %110 : vector<8x32xf32>
    %134 = arith.mulf %129, %131 : vector<8x32xf32>
    %135 = arith.addf %133, %134 : vector<8x32xf32>
    %136 = math.tanh %135 : vector<8x32xf32>
    %137 = arith.mulf %132, %136 : vector<8x32xf32>
    %138 = arith.index_cast %c4_i32 : i32 to index
    %c0_40 = arith.constant 0 : index
    %c0_41 = arith.constant 0 : index
    %139 = vector.load %arg11[%138, %c0_40, %c0_41] : memref<8x8x32xf32, #tpu.memory_space<vmem>>, vector<1x8x32xf32>
    %140 = vector.shape_cast %139 : vector<1x8x32xf32> to vector<8x32xf32>
    %141 = vector.shape_cast %137 : vector<8x32xf32> to vector<1x8x32xf32>
    tpu.vector_store %arg11[%138, %c0_40, %c0_41], %141 {strides = array<i32>} : memref<8x8x32xf32, #tpu.memory_space<vmem>>, vector<1x8x32xf32>,
    %c5_i32 = arith.constant 5 : i32
    %142 = arith.index_cast %c5_i32 : i32 to index
    %c0_42 = arith.constant 0 : index
    %c0_43 = arith.constant 0 : index
    %143 = vector.load %arg10[%142, %c0_42, %c0_43] : memref<8x8x128xf32, #tpu.memory_space<vmem>>, vector<1x8x128xf32>
    %144 = vector.shape_cast %143 : vector<1x8x128xf32> to vector<8x128xf32>
    %cst_44 = arith.constant dense<0.000000e+00> : vector<8x128xf32>
    %145 = tpu.matmul %137, %15, %cst_44 {dimension_numbers = #tpu.dot_dimension_numbers<[1], [0], [0], [1], [0, 0, 1, 1], [], []>} : vector<8x32xf32>, vector<32x128xf32>, vector<8x128xf32> -> vector<8x128xf32>
    %146 = arith.addf %144, %145 : vector<8x128xf32>
    %147 = math.tanh %146 : vector<8x128xf32>
    %148 = arith.negf %146 : vector<8x128xf32>
    %149 = math.exp %148 : vector<8x128xf32>
    %cst_45 = arith.constant 1.000000e+00 : f32
    %150 = vector.broadcast %cst_45 : f32 to vector<8x128xf32>
    %151 = arith.addf %150, %149 : vector<8x128xf32>
    %152 = arith.divf %150, %151 : vector<8x128xf32>
    %153 = arith.select %5, %147, %152 : vector<8x128xi1>, vector<8x128xf32>
    %154 = vector.extract_strided_slice %153 {offsets = [0, 0], sizes = [8, 32], strides = [1, 1]} : vector<8x128xf32> to vector<8x32xf32>
    %155 = vector.extract_strided_slice %153 {offsets = [0, 32], sizes = [8, 32], strides = [1, 1]} : vector<8x128xf32> to vector<8x32xf32>
    %156 = vector.extract_strided_slice %153 {offsets = [0, 64], sizes = [8, 32], strides = [1, 1]} : vector<8x128xf32> to vector<8x32xf32>
    %157 = vector.extract_strided_slice %153 {offsets = [0, 96], sizes = [8, 32], strides = [1, 1]} : vector<8x128xf32> to vector<8x32xf32>
    %158 = arith.mulf %155, %135 : vector<8x32xf32>
    %159 = arith.mulf %154, %156 : vector<8x32xf32>
    %160 = arith.addf %158, %159 : vector<8x32xf32>
    %161 = math.tanh %160 : vector<8x32xf32>
    %162 = arith.mulf %157, %161 : vector<8x32xf32>
    %163 = arith.index_cast %c5_i32 : i32 to index
    %c0_46 = arith.constant 0 : index
    %c0_47 = arith.constant 0 : index
    %164 = vector.load %arg11[%163, %c0_46, %c0_47] : memref<8x8x32xf32, #tpu.memory_space<vmem>>, vector<1x8x32xf32>
    %165 = vector.shape_cast %164 : vector<1x8x32xf32> to vector<8x32xf32>
    %166 = vector.shape_cast %162 : vector<8x32xf32> to vector<1x8x32xf32>
    tpu.vector_store %arg11[%163, %c0_46, %c0_47], %166 {strides = array<i32>} : memref<8x8x32xf32, #tpu.memory_space<vmem>>, vector<1x8x32xf32>,
    %c6_i32 = arith.constant 6 : i32
    %167 = arith.index_cast %c6_i32 : i32 to index
    %c0_48 = arith.constant 0 : index
    %c0_49 = arith.constant 0 : index
    %168 = vector.load %arg10[%167, %c0_48, %c0_49] : memref<8x8x128xf32, #tpu.memory_space<vmem>>, vector<1x8x128xf32>
    %169 = vector.shape_cast %168 : vector<1x8x128xf32> to vector<8x128xf32>
    %cst_50 = arith.constant dense<0.000000e+00> : vector<8x128xf32>
    %170 = tpu.matmul %162, %15, %cst_50 {dimension_numbers = #tpu.dot_dimension_numbers<[1], [0], [0], [1], [0, 0, 1, 1], [], []>} : vector<8x32xf32>, vector<32x128xf32>, vector<8x128xf32> -> vector<8x128xf32>
    %171 = arith.addf %169, %170 : vector<8x128xf32>
    %172 = math.tanh %171 : vector<8x128xf32>
    %173 = arith.negf %171 : vector<8x128xf32>
    %174 = math.exp %173 : vector<8x128xf32>
    %cst_51 = arith.constant 1.000000e+00 : f32
    %175 = vector.broadcast %cst_51 : f32 to vector<8x128xf32>
    %176 = arith.addf %175, %174 : vector<8x128xf32>
    %177 = arith.divf %175, %176 : vector<8x128xf32>
    %178 = arith.select %5, %172, %177 : vector<8x128xi1>, vector<8x128xf32>
    %179 = vector.extract_strided_slice %178 {offsets = [0, 0], sizes = [8, 32], strides = [1, 1]} : vector<8x128xf32> to vector<8x32xf32>
    %180 = vector.extract_strided_slice %178 {offsets = [0, 32], sizes = [8, 32], strides = [1, 1]} : vector<8x128xf32> to vector<8x32xf32>
    %181 = vector.extract_strided_slice %178 {offsets = [0, 64], sizes = [8, 32], strides = [1, 1]} : vector<8x128xf32> to vector<8x32xf32>
    %182 = vector.extract_strided_slice %178 {offsets = [0, 96], sizes = [8, 32], strides = [1, 1]} : vector<8x128xf32> to vector<8x32xf32>
    %183 = arith.mulf %180, %160 : vector<8x32xf32>
    %184 = arith.mulf %179, %181 : vector<8x32xf32>
    %185 = arith.addf %183, %184 : vector<8x32xf32>
    %186 = math.tanh %185 : vector<8x32xf32>
    %187 = arith.mulf %182, %186 : vector<8x32xf32>
    %188 = arith.index_cast %c6_i32 : i32 to index
    %c0_52 = arith.constant 0 : index
    %c0_53 = arith.constant 0 : index
    %189 = vector.load %arg11[%188, %c0_52, %c0_53] : memref<8x8x32xf32, #tpu.memory_space<vmem>>, vector<1x8x32xf32>
    %190 = vector.shape_cast %189 : vector<1x8x32xf32> to vector<8x32xf32>
    %191 = vector.shape_cast %187 : vector<8x32xf32> to vector<1x8x32xf32>
    tpu.vector_store %arg11[%188, %c0_52, %c0_53], %191 {strides = array<i32>} : memref<8x8x32xf32, #tpu.memory_space<vmem>>, vector<1x8x32xf32>,
    %c7_i32 = arith.constant 7 : i32
    %192 = arith.index_cast %c7_i32 : i32 to index
    %c0_54 = arith.constant 0 : index
    %c0_55 = arith.constant 0 : index
    %193 = vector.load %arg10[%192, %c0_54, %c0_55] : memref<8x8x128xf32, #tpu.memory_space<vmem>>, vector<1x8x128xf32>
    %194 = vector.shape_cast %193 : vector<1x8x128xf32> to vector<8x128xf32>
    %cst_56 = arith.constant dense<0.000000e+00> : vector<8x128xf32>
    %195 = tpu.matmul %187, %15, %cst_56 {dimension_numbers = #tpu.dot_dimension_numbers<[1], [0], [0], [1], [0, 0, 1, 1], [], []>} : vector<8x32xf32>, vector<32x128xf32>, vector<8x128xf32> -> vector<8x128xf32>
    %196 = arith.addf %194, %195 : vector<8x128xf32>
    %197 = math.tanh %196 : vector<8x128xf32>
    %198 = arith.negf %196 : vector<8x128xf32>
    %199 = math.exp %198 : vector<8x128xf32>
    %cst_57 = arith.constant 1.000000e+00 : f32
    %200 = vector.broadcast %cst_57 : f32 to vector<8x128xf32>
    %201 = arith.addf %200, %199 : vector<8x128xf32>
    %202 = arith.divf %200, %201 : vector<8x128xf32>
    %203 = arith.select %5, %197, %202 : vector<8x128xi1>, vector<8x128xf32>
    %204 = vector.extract_strided_slice %203 {offsets = [0, 0], sizes = [8, 32], strides = [1, 1]} : vector<8x128xf32> to vector<8x32xf32>
    %205 = vector.extract_strided_slice %203 {offsets = [0, 32], sizes = [8, 32], strides = [1, 1]} : vector<8x128xf32> to vector<8x32xf32>
    %206 = vector.extract_strided_slice %203 {offsets = [0, 64], sizes = [8, 32], strides = [1, 1]} : vector<8x128xf32> to vector<8x32xf32>
    %207 = vector.extract_strided_slice %203 {offsets = [0, 96], sizes = [8, 32], strides = [1, 1]} : vector<8x128xf32> to vector<8x32xf32>
    %208 = arith.mulf %205, %185 : vector<8x32xf32>
    %209 = arith.mulf %204, %206 : vector<8x32xf32>
    %210 = arith.addf %208, %209 : vector<8x32xf32>
    %211 = math.tanh %210 : vector<8x32xf32>
    %212 = arith.mulf %207, %211 : vector<8x32xf32>
    %213 = arith.index_cast %c7_i32 : i32 to index
    %c0_58 = arith.constant 0 : index
    %c0_59 = arith.constant 0 : index
    %214 = vector.load %arg11[%213, %c0_58, %c0_59] : memref<8x8x32xf32, #tpu.memory_space<vmem>>, vector<1x8x32xf32>
    %215 = vector.shape_cast %214 : vector<1x8x32xf32> to vector<8x32xf32>
    %216 = vector.shape_cast %212 : vector<8x32xf32> to vector<1x8x32xf32>
    tpu.vector_store %arg11[%213, %c0_58, %c0_59], %216 {strides = array<i32>} : memref<8x8x32xf32, #tpu.memory_space<vmem>>, vector<1x8x32xf32>,
    %c8_i32 = arith.constant 8 : i32
    %c0_60 = arith.constant 0 : index
    %c0_61 = arith.constant 0 : index
    %c0_62 = arith.constant 0 : index
    %217 = vector.load %arg11[%c0_60, %c0_61, %c0_62] : memref<8x8x32xf32, #tpu.memory_space<vmem>>, vector<8x8x32xf32>
    %218 = vector.shape_cast %217 : vector<8x8x32xf32> to vector<64x32xf32>
    %c0_63 = arith.constant 0 : index
    %c0_64 = arith.constant 0 : index
    %219 = vector.load %arg2[%c0_63, %c0_64] : memref<32x128xf32, #tpu.memory_space<vmem>>, vector<32x128xf32>
    %cst_65 = arith.constant dense<0.000000e+00> : vector<64x128xf32>
    %220 = tpu.matmul %218, %219, %cst_65 {dimension_numbers = #tpu.dot_dimension_numbers<[1], [0], [0], [1], [0, 0, 1, 1], [], []>} : vector<64x32xf32>, vector<32x128xf32>, vector<64x128xf32> -> vector<64x128xf32>
    %c0_66 = arith.constant 0 : index
    %c0_67 = arith.constant 0 : index
    %221 = vector.load %arg6[%c0_66, %c0_67] : memref<1x128xf32, #tpu.memory_space<vmem>>, vector<1x128xf32>
    %222 = vector.broadcast %221 : vector<1x128xf32> to vector<64x128xf32>
    %223 = arith.addf %220, %222 : vector<64x128xf32>
    %224 = vector.shape_cast %223 : vector<64x128xf32> to vector<8x8x128xf32>
    %c0_68 = arith.constant 0 : index
    %c0_69 = arith.constant 0 : index
    %c0_70 = arith.constant 0 : index
    %225 = vector.load %arg10[%c0_68, %c0_69, %c0_70] : memref<8x8x128xf32, #tpu.memory_space<vmem>>, vector<8x8x128xf32>
    tpu.vector_store %arg10[%c0_68, %c0_69, %c0_70], %224 {strides = array<i32>} : memref<8x8x128xf32, #tpu.memory_space<vmem>>, vector<8x8x128xf32>,
    %c0_71 = arith.constant 0 : index
    %c0_72 = arith.constant 0 : index
    %226 = vector.load %arg4[%c0_71, %c0_72] : memref<32x128xf32, #tpu.memory_space<vmem>>, vector<32x128xf32>
    %cst_73 = arith.constant 0.000000e+00 : f32
    %227 = vector.broadcast %cst_73 : f32 to vector<8x32xf32>
    %c0_i32_74 = arith.constant 0 : i32
    %228 = arith.index_cast %c0_i32_74 : i32 to index
    %c0_75 = arith.constant 0 : index
    %c0_76 = arith.constant 0 : index
    %229 = vector.load %arg10[%228, %c0_75, %c0_76] : memref<8x8x128xf32, #tpu.memory_space<vmem>>, vector<1x8x128xf32>
    %230 = vector.shape_cast %229 : vector<1x8x128xf32> to vector<8x128xf32>
    %cst_77 = arith.constant dense<0.000000e+00> : vector<8x128xf32>
    %231 = tpu.matmul %227, %226, %cst_77 {dimension_numbers = #tpu.dot_dimension_numbers<[1], [0], [0], [1], [0, 0, 1, 1], [], []>} : vector<8x32xf32>, vector<32x128xf32>, vector<8x128xf32> -> vector<8x128xf32>
    %232 = arith.addf %230, %231 : vector<8x128xf32>
    %233 = math.tanh %232 : vector<8x128xf32>
    %234 = arith.negf %232 : vector<8x128xf32>
    %235 = math.exp %234 : vector<8x128xf32>
    %cst_78 = arith.constant 1.000000e+00 : f32
    %236 = vector.broadcast %cst_78 : f32 to vector<8x128xf32>
    %237 = arith.addf %236, %235 : vector<8x128xf32>
    %238 = arith.divf %236, %237 : vector<8x128xf32>
    %239 = arith.select %5, %233, %238 : vector<8x128xi1>, vector<8x128xf32>
    %240 = vector.extract_strided_slice %239 {offsets = [0, 0], sizes = [8, 32], strides = [1, 1]} : vector<8x128xf32> to vector<8x32xf32>
    %241 = vector.extract_strided_slice %239 {offsets = [0, 32], sizes = [8, 32], strides = [1, 1]} : vector<8x128xf32> to vector<8x32xf32>
    %242 = vector.extract_strided_slice %239 {offsets = [0, 64], sizes = [8, 32], strides = [1, 1]} : vector<8x128xf32> to vector<8x32xf32>
    %243 = vector.extract_strided_slice %239 {offsets = [0, 96], sizes = [8, 32], strides = [1, 1]} : vector<8x128xf32> to vector<8x32xf32>
    %244 = arith.mulf %241, %227 : vector<8x32xf32>
    %245 = arith.mulf %240, %242 : vector<8x32xf32>
    %246 = arith.addf %244, %245 : vector<8x32xf32>
    %247 = math.tanh %246 : vector<8x32xf32>
    %248 = arith.mulf %243, %247 : vector<8x32xf32>
    %c1_i32_79 = arith.constant 1 : i32
    %249 = arith.index_cast %c1_i32_79 : i32 to index
    %c0_80 = arith.constant 0 : index
    %c0_81 = arith.constant 0 : index
    %250 = vector.load %arg10[%249, %c0_80, %c0_81] : memref<8x8x128xf32, #tpu.memory_space<vmem>>, vector<1x8x128xf32>
    %251 = vector.shape_cast %250 : vector<1x8x128xf32> to vector<8x128xf32>
    %cst_82 = arith.constant dense<0.000000e+00> : vector<8x128xf32>
    %252 = tpu.matmul %248, %226, %cst_82 {dimension_numbers = #tpu.dot_dimension_numbers<[1], [0], [0], [1], [0, 0, 1, 1], [], []>} : vector<8x32xf32>, vector<32x128xf32>, vector<8x128xf32> -> vector<8x128xf32>
    %253 = arith.addf %251, %252 : vector<8x128xf32>
    %254 = math.tanh %253 : vector<8x128xf32>
    %255 = arith.negf %253 : vector<8x128xf32>
    %256 = math.exp %255 : vector<8x128xf32>
    %cst_83 = arith.constant 1.000000e+00 : f32
    %257 = vector.broadcast %cst_83 : f32 to vector<8x128xf32>
    %258 = arith.addf %257, %256 : vector<8x128xf32>
    %259 = arith.divf %257, %258 : vector<8x128xf32>
    %260 = arith.select %5, %254, %259 : vector<8x128xi1>, vector<8x128xf32>
    %261 = vector.extract_strided_slice %260 {offsets = [0, 0], sizes = [8, 32], strides = [1, 1]} : vector<8x128xf32> to vector<8x32xf32>
    %262 = vector.extract_strided_slice %260 {offsets = [0, 32], sizes = [8, 32], strides = [1, 1]} : vector<8x128xf32> to vector<8x32xf32>
    %263 = vector.extract_strided_slice %260 {offsets = [0, 64], sizes = [8, 32], strides = [1, 1]} : vector<8x128xf32> to vector<8x32xf32>
    %264 = vector.extract_strided_slice %260 {offsets = [0, 96], sizes = [8, 32], strides = [1, 1]} : vector<8x128xf32> to vector<8x32xf32>
    %265 = arith.mulf %262, %246 : vector<8x32xf32>
    %266 = arith.mulf %261, %263 : vector<8x32xf32>
    %267 = arith.addf %265, %266 : vector<8x32xf32>
    %268 = math.tanh %267 : vector<8x32xf32>
    %269 = arith.mulf %264, %268 : vector<8x32xf32>
    %c2_i32_84 = arith.constant 2 : i32
    %270 = arith.index_cast %c2_i32_84 : i32 to index
    %c0_85 = arith.constant 0 : index
    %c0_86 = arith.constant 0 : index
    %271 = vector.load %arg10[%270, %c0_85, %c0_86] : memref<8x8x128xf32, #tpu.memory_space<vmem>>, vector<1x8x128xf32>
    %272 = vector.shape_cast %271 : vector<1x8x128xf32> to vector<8x128xf32>
    %cst_87 = arith.constant dense<0.000000e+00> : vector<8x128xf32>
    %273 = tpu.matmul %269, %226, %cst_87 {dimension_numbers = #tpu.dot_dimension_numbers<[1], [0], [0], [1], [0, 0, 1, 1], [], []>} : vector<8x32xf32>, vector<32x128xf32>, vector<8x128xf32> -> vector<8x128xf32>
    %274 = arith.addf %272, %273 : vector<8x128xf32>
    %275 = math.tanh %274 : vector<8x128xf32>
    %276 = arith.negf %274 : vector<8x128xf32>
    %277 = math.exp %276 : vector<8x128xf32>
    %cst_88 = arith.constant 1.000000e+00 : f32
    %278 = vector.broadcast %cst_88 : f32 to vector<8x128xf32>
    %279 = arith.addf %278, %277 : vector<8x128xf32>
    %280 = arith.divf %278, %279 : vector<8x128xf32>
    %281 = arith.select %5, %275, %280 : vector<8x128xi1>, vector<8x128xf32>
    %282 = vector.extract_strided_slice %281 {offsets = [0, 0], sizes = [8, 32], strides = [1, 1]} : vector<8x128xf32> to vector<8x32xf32>
    %283 = vector.extract_strided_slice %281 {offsets = [0, 32], sizes = [8, 32], strides = [1, 1]} : vector<8x128xf32> to vector<8x32xf32>
    %284 = vector.extract_strided_slice %281 {offsets = [0, 64], sizes = [8, 32], strides = [1, 1]} : vector<8x128xf32> to vector<8x32xf32>
    %285 = vector.extract_strided_slice %281 {offsets = [0, 96], sizes = [8, 32], strides = [1, 1]} : vector<8x128xf32> to vector<8x32xf32>
    %286 = arith.mulf %283, %267 : vector<8x32xf32>
    %287 = arith.mulf %282, %284 : vector<8x32xf32>
    %288 = arith.addf %286, %287 : vector<8x32xf32>
    %289 = math.tanh %288 : vector<8x32xf32>
    %290 = arith.mulf %285, %289 : vector<8x32xf32>
    %c3_i32_89 = arith.constant 3 : i32
    %291 = arith.index_cast %c3_i32_89 : i32 to index
    %c0_90 = arith.constant 0 : index
    %c0_91 = arith.constant 0 : index
    %292 = vector.load %arg10[%291, %c0_90, %c0_91] : memref<8x8x128xf32, #tpu.memory_space<vmem>>, vector<1x8x128xf32>
    %293 = vector.shape_cast %292 : vector<1x8x128xf32> to vector<8x128xf32>
    %cst_92 = arith.constant dense<0.000000e+00> : vector<8x128xf32>
    %294 = tpu.matmul %290, %226, %cst_92 {dimension_numbers = #tpu.dot_dimension_numbers<[1], [0], [0], [1], [0, 0, 1, 1], [], []>} : vector<8x32xf32>, vector<32x128xf32>, vector<8x128xf32> -> vector<8x128xf32>
    %295 = arith.addf %293, %294 : vector<8x128xf32>
    %296 = math.tanh %295 : vector<8x128xf32>
    %297 = arith.negf %295 : vector<8x128xf32>
    %298 = math.exp %297 : vector<8x128xf32>
    %cst_93 = arith.constant 1.000000e+00 : f32
    %299 = vector.broadcast %cst_93 : f32 to vector<8x128xf32>
    %300 = arith.addf %299, %298 : vector<8x128xf32>
    %301 = arith.divf %299, %300 : vector<8x128xf32>
    %302 = arith.select %5, %296, %301 : vector<8x128xi1>, vector<8x128xf32>
    %303 = vector.extract_strided_slice %302 {offsets = [0, 0], sizes = [8, 32], strides = [1, 1]} : vector<8x128xf32> to vector<8x32xf32>
    %304 = vector.extract_strided_slice %302 {offsets = [0, 32], sizes = [8, 32], strides = [1, 1]} : vector<8x128xf32> to vector<8x32xf32>
    %305 = vector.extract_strided_slice %302 {offsets = [0, 64], sizes = [8, 32], strides = [1, 1]} : vector<8x128xf32> to vector<8x32xf32>
    %306 = vector.extract_strided_slice %302 {offsets = [0, 96], sizes = [8, 32], strides = [1, 1]} : vector<8x128xf32> to vector<8x32xf32>
    %307 = arith.mulf %304, %288 : vector<8x32xf32>
    %308 = arith.mulf %303, %305 : vector<8x32xf32>
    %309 = arith.addf %307, %308 : vector<8x32xf32>
    %310 = math.tanh %309 : vector<8x32xf32>
    %311 = arith.mulf %306, %310 : vector<8x32xf32>
    %c4_i32_94 = arith.constant 4 : i32
    %312 = arith.index_cast %c4_i32_94 : i32 to index
    %c0_95 = arith.constant 0 : index
    %c0_96 = arith.constant 0 : index
    %313 = vector.load %arg10[%312, %c0_95, %c0_96] : memref<8x8x128xf32, #tpu.memory_space<vmem>>, vector<1x8x128xf32>
    %314 = vector.shape_cast %313 : vector<1x8x128xf32> to vector<8x128xf32>
    %cst_97 = arith.constant dense<0.000000e+00> : vector<8x128xf32>
    %315 = tpu.matmul %311, %226, %cst_97 {dimension_numbers = #tpu.dot_dimension_numbers<[1], [0], [0], [1], [0, 0, 1, 1], [], []>} : vector<8x32xf32>, vector<32x128xf32>, vector<8x128xf32> -> vector<8x128xf32>
    %316 = arith.addf %314, %315 : vector<8x128xf32>
    %317 = math.tanh %316 : vector<8x128xf32>
    %318 = arith.negf %316 : vector<8x128xf32>
    %319 = math.exp %318 : vector<8x128xf32>
    %cst_98 = arith.constant 1.000000e+00 : f32
    %320 = vector.broadcast %cst_98 : f32 to vector<8x128xf32>
    %321 = arith.addf %320, %319 : vector<8x128xf32>
    %322 = arith.divf %320, %321 : vector<8x128xf32>
    %323 = arith.select %5, %317, %322 : vector<8x128xi1>, vector<8x128xf32>
    %324 = vector.extract_strided_slice %323 {offsets = [0, 0], sizes = [8, 32], strides = [1, 1]} : vector<8x128xf32> to vector<8x32xf32>
    %325 = vector.extract_strided_slice %323 {offsets = [0, 32], sizes = [8, 32], strides = [1, 1]} : vector<8x128xf32> to vector<8x32xf32>
    %326 = vector.extract_strided_slice %323 {offsets = [0, 64], sizes = [8, 32], strides = [1, 1]} : vector<8x128xf32> to vector<8x32xf32>
    %327 = vector.extract_strided_slice %323 {offsets = [0, 96], sizes = [8, 32], strides = [1, 1]} : vector<8x128xf32> to vector<8x32xf32>
    %328 = arith.mulf %325, %309 : vector<8x32xf32>
    %329 = arith.mulf %324, %326 : vector<8x32xf32>
    %330 = arith.addf %328, %329 : vector<8x32xf32>
    %331 = math.tanh %330 : vector<8x32xf32>
    %332 = arith.mulf %327, %331 : vector<8x32xf32>
    %c5_i32_99 = arith.constant 5 : i32
    %333 = arith.index_cast %c5_i32_99 : i32 to index
    %c0_100 = arith.constant 0 : index
    %c0_101 = arith.constant 0 : index
    %334 = vector.load %arg10[%333, %c0_100, %c0_101] : memref<8x8x128xf32, #tpu.memory_space<vmem>>, vector<1x8x128xf32>
    %335 = vector.shape_cast %334 : vector<1x8x128xf32> to vector<8x128xf32>
    %cst_102 = arith.constant dense<0.000000e+00> : vector<8x128xf32>
    %336 = tpu.matmul %332, %226, %cst_102 {dimension_numbers = #tpu.dot_dimension_numbers<[1], [0], [0], [1], [0, 0, 1, 1], [], []>} : vector<8x32xf32>, vector<32x128xf32>, vector<8x128xf32> -> vector<8x128xf32>
    %337 = arith.addf %335, %336 : vector<8x128xf32>
    %338 = math.tanh %337 : vector<8x128xf32>
    %339 = arith.negf %337 : vector<8x128xf32>
    %340 = math.exp %339 : vector<8x128xf32>
    %cst_103 = arith.constant 1.000000e+00 : f32
    %341 = vector.broadcast %cst_103 : f32 to vector<8x128xf32>
    %342 = arith.addf %341, %340 : vector<8x128xf32>
    %343 = arith.divf %341, %342 : vector<8x128xf32>
    %344 = arith.select %5, %338, %343 : vector<8x128xi1>, vector<8x128xf32>
    %345 = vector.extract_strided_slice %344 {offsets = [0, 0], sizes = [8, 32], strides = [1, 1]} : vector<8x128xf32> to vector<8x32xf32>
    %346 = vector.extract_strided_slice %344 {offsets = [0, 32], sizes = [8, 32], strides = [1, 1]} : vector<8x128xf32> to vector<8x32xf32>
    %347 = vector.extract_strided_slice %344 {offsets = [0, 64], sizes = [8, 32], strides = [1, 1]} : vector<8x128xf32> to vector<8x32xf32>
    %348 = vector.extract_strided_slice %344 {offsets = [0, 96], sizes = [8, 32], strides = [1, 1]} : vector<8x128xf32> to vector<8x32xf32>
    %349 = arith.mulf %346, %330 : vector<8x32xf32>
    %350 = arith.mulf %345, %347 : vector<8x32xf32>
    %351 = arith.addf %349, %350 : vector<8x32xf32>
    %352 = math.tanh %351 : vector<8x32xf32>
    %353 = arith.mulf %348, %352 : vector<8x32xf32>
    %c6_i32_104 = arith.constant 6 : i32
    %354 = arith.index_cast %c6_i32_104 : i32 to index
    %c0_105 = arith.constant 0 : index
    %c0_106 = arith.constant 0 : index
    %355 = vector.load %arg10[%354, %c0_105, %c0_106] : memref<8x8x128xf32, #tpu.memory_space<vmem>>, vector<1x8x128xf32>
    %356 = vector.shape_cast %355 : vector<1x8x128xf32> to vector<8x128xf32>
    %cst_107 = arith.constant dense<0.000000e+00> : vector<8x128xf32>
    %357 = tpu.matmul %353, %226, %cst_107 {dimension_numbers = #tpu.dot_dimension_numbers<[1], [0], [0], [1], [0, 0, 1, 1], [], []>} : vector<8x32xf32>, vector<32x128xf32>, vector<8x128xf32> -> vector<8x128xf32>
    %358 = arith.addf %356, %357 : vector<8x128xf32>
    %359 = math.tanh %358 : vector<8x128xf32>
    %360 = arith.negf %358 : vector<8x128xf32>
    %361 = math.exp %360 : vector<8x128xf32>
    %cst_108 = arith.constant 1.000000e+00 : f32
    %362 = vector.broadcast %cst_108 : f32 to vector<8x128xf32>
    %363 = arith.addf %362, %361 : vector<8x128xf32>
    %364 = arith.divf %362, %363 : vector<8x128xf32>
    %365 = arith.select %5, %359, %364 : vector<8x128xi1>, vector<8x128xf32>
    %366 = vector.extract_strided_slice %365 {offsets = [0, 0], sizes = [8, 32], strides = [1, 1]} : vector<8x128xf32> to vector<8x32xf32>
    %367 = vector.extract_strided_slice %365 {offsets = [0, 32], sizes = [8, 32], strides = [1, 1]} : vector<8x128xf32> to vector<8x32xf32>
    %368 = vector.extract_strided_slice %365 {offsets = [0, 64], sizes = [8, 32], strides = [1, 1]} : vector<8x128xf32> to vector<8x32xf32>
    %369 = vector.extract_strided_slice %365 {offsets = [0, 96], sizes = [8, 32], strides = [1, 1]} : vector<8x128xf32> to vector<8x32xf32>
    %370 = arith.mulf %367, %351 : vector<8x32xf32>
    %371 = arith.mulf %366, %368 : vector<8x32xf32>
    %372 = arith.addf %370, %371 : vector<8x32xf32>
    %373 = math.tanh %372 : vector<8x32xf32>
    %374 = arith.mulf %369, %373 : vector<8x32xf32>
    %c7_i32_109 = arith.constant 7 : i32
    %375 = arith.index_cast %c7_i32_109 : i32 to index
    %c0_110 = arith.constant 0 : index
    %c0_111 = arith.constant 0 : index
    %376 = vector.load %arg10[%375, %c0_110, %c0_111] : memref<8x8x128xf32, #tpu.memory_space<vmem>>, vector<1x8x128xf32>
    %377 = vector.shape_cast %376 : vector<1x8x128xf32> to vector<8x128xf32>
    %cst_112 = arith.constant dense<0.000000e+00> : vector<8x128xf32>
    %378 = tpu.matmul %374, %226, %cst_112 {dimension_numbers = #tpu.dot_dimension_numbers<[1], [0], [0], [1], [0, 0, 1, 1], [], []>} : vector<8x32xf32>, vector<32x128xf32>, vector<8x128xf32> -> vector<8x128xf32>
    %379 = arith.addf %377, %378 : vector<8x128xf32>
    %380 = math.tanh %379 : vector<8x128xf32>
    %381 = arith.negf %379 : vector<8x128xf32>
    %382 = math.exp %381 : vector<8x128xf32>
    %cst_113 = arith.constant 1.000000e+00 : f32
    %383 = vector.broadcast %cst_113 : f32 to vector<8x128xf32>
    %384 = arith.addf %383, %382 : vector<8x128xf32>
    %385 = arith.divf %383, %384 : vector<8x128xf32>
    %386 = arith.select %5, %380, %385 : vector<8x128xi1>, vector<8x128xf32>
    %387 = vector.extract_strided_slice %386 {offsets = [0, 0], sizes = [8, 32], strides = [1, 1]} : vector<8x128xf32> to vector<8x32xf32>
    %388 = vector.extract_strided_slice %386 {offsets = [0, 32], sizes = [8, 32], strides = [1, 1]} : vector<8x128xf32> to vector<8x32xf32>
    %389 = vector.extract_strided_slice %386 {offsets = [0, 64], sizes = [8, 32], strides = [1, 1]} : vector<8x128xf32> to vector<8x32xf32>
    %390 = vector.extract_strided_slice %386 {offsets = [0, 96], sizes = [8, 32], strides = [1, 1]} : vector<8x128xf32> to vector<8x32xf32>
    %391 = arith.mulf %388, %372 : vector<8x32xf32>
    %392 = arith.mulf %387, %389 : vector<8x32xf32>
    %393 = arith.addf %391, %392 : vector<8x32xf32>
    %394 = math.tanh %393 : vector<8x32xf32>
    %395 = arith.mulf %390, %394 : vector<8x32xf32>
    %c8_i32_114 = arith.constant 8 : i32
    %c0_115 = arith.constant 0 : index
    %c0_116 = arith.constant 0 : index
    %396 = vector.load %arg7[%c0_115, %c0_116] : memref<1x32xf32, #tpu.memory_space<vmem>>, vector<1x32xf32>
    %397 = vector.broadcast %396 : vector<1x32xf32> to vector<8x32xf32>
    %398 = arith.mulf %395, %397 : vector<8x32xf32>
    %cst_117 = arith.constant dense<0.000000e+00> : vector<8xf32>
    %399 = vector.multi_reduction <add>, %398, %cst_117 [1] : vector<8x32xf32> to vector<8xf32>
    %400 = vector.shape_cast %399 : vector<8xf32> to vector<8x1xf32>
    %c0_118 = arith.constant 0 : index
    %c0_119 = arith.constant 0 : index
    %401 = vector.load %arg8[%c0_118, %c0_119] : memref<1x1xf32, #tpu.memory_space<vmem>>, vector<1x1xf32>
    %402 = vector.broadcast %401 : vector<1x1xf32> to vector<8x1xf32>
    %403 = arith.addf %400, %402 : vector<8x1xf32>
    %c0_120 = arith.constant 0 : index
    %c0_121 = arith.constant 0 : index
    %404 = vector.load %arg9[%c0_120, %c0_121] : memref<8x1xf32, #tpu.memory_space<vmem>>, vector<8x1xf32>
    tpu.vector_store %arg9[%c0_120, %c0_121], %403 {strides = array<i32>} : memref<8x1xf32, #tpu.memory_space<vmem>>, vector<8x1xf32>,
    return
  }
}

</mosaic_0001>

<bundles_post_ra>
// kernel: lstm_model_forward.1
= control target key start
LH: loop header
LB: loop body
LE: loop exit
PB: predicated region body
PF: predicated region fallthrough
CT: control target
= control target key end

     0   :  { %vm56_vm0 = vcmask 130048   ;;  %v2654_v0 = vmov 0.0|0.0   ;;  %vm2655_vm1 = vmmov 0   ;;  %v2656_v4 = vmov 0.0   ;;  %s2658_s25 = smov 32   ;;  %s2659_s11 = smov 96   ;;  %s3093_s1 = inlined_call_operand.vmem [shape: f32[16,128], index: 1, kind: input, shape index: {}]   ;;  %s3094_s3 = inlined_call_operand.vmem [shape: f32[32,128], index: 3, kind: input, shape index: {}]   ;;  %s3095_s0 = inlined_call_operand.vmem [shape: f32[8,8,16], index: 0, kind: input, shape index: {}]   ;;  %s3096_s5 = inlined_call_operand.vmem [shape: f32[1,128], index: 5, kind: input, shape index: {}]   ;;  %s3097_s2 = inlined_call_operand.vmem [shape: f32[32,128], index: 2, kind: input, shape index: {}]   ;;  %s3098_s4 = inlined_call_operand.vmem [shape: f32[32,128], index: 4, kind: input, shape index: {}]   ;;  %s3099_s6 = inlined_call_operand.vmem [shape: f32[1,128], index: 6, kind: input, shape index: {}]   ;;  %s3100_s7 = inlined_call_operand.vmem [shape: f32[1,32], index: 7, kind: input, shape index: {}]   ;;  %s3101_s8 = inlined_call_operand.<no memory space> [shape: f32[1,1], index: 8, kind: input, shape index: {}]   ;;  %s3102_s9 = inlined_call_operand.vmem [shape: f32[8,1], index: 9, kind: output, shape index: {}]  }
   0x1   :  { %2416 = vmatprep.subr.bf16.mxu1 %v2654_v0  ;;  %v47_v1 = vld [vmem:[%s3093_s1] sm:$0xff]  ;;  %v48_v2 = vld [vmem:[%s3093_s1 + $0x8] sm:$0xff]  ;;  %2224 = vmatprep.mubr.msk.f32.mxu1 %vm2655_vm1, %v2656_v4  ;;  %v196_v9 = vld [vmem:[%s3094_s3 + $0x10] sm:$0xff]  ;;  %v34_v22 = vlaneseq  ;;  %vm199_vm5 = vcmask 261120   ;;  %v14_v25 = vstv %s3101_s8  ;;  %vm2042_vm6 = vcmask 7168  }
   0x2   :  { %v194_v3 = vld [vmem:[%s3094_s3] sm:$0xff]  ;;  %v2412_v5 = vpack.c.bf16 %v48_v2, %v47_v1  ;;  %v195_v6 = vld [vmem:[%s3094_s3 + $0x8] sm:$0xff]  ;;  %v197_v10 = vld [vmem:[%s3094_s3 + $0x18] sm:$0xff]  ;;  %15 = vst [vmem:[#allocation4] sm:$0x1] %v14_v25 }
   0x3   :  { %v39_v7 = vld [vmem:[%s3095_s0] sm:$0xff]  ;;  %v2728_v8 = vpack.c.bf16 %v195_v6, %v194_v3  ;;  %v40_v11 = vld [vmem:[%s3095_s0 + $0x8] sm:$0xff]  ;;  %v2741_v12 = vpack.c.bf16 %v197_v10, %v196_v9  ;;  %v35_v24 = vand.u32 127, %v34_v22  ;;  %v41_v53 = vld [vmem:[%s3095_s0 + $0x10] sm:$0xff] }
   0x4   :  { %2204 = vmatprep.mubr.msk.f32.mxu0 %vm56_vm0, %v39_v7  ;;  %2413 = vmatprep.subr.bf16.mxu0 %v2412_v5  ;;  %v2762_v13 = vld [vmem:[%s3096_s5] ss:$0 sm:$0xff]  ;;  %s2657_s5 = smov 64   ;;  %v42_v54 = vld [vmem:[%s3095_s0 + $0x18] sm:$0xff]  ;;  %v44_v56 = vld [vmem:[%s3095_s0 + $0x28] sm:$0xff] }
   0x5   :  { %2418 = vmatpush3.bf16.msra.mxu1 %v2728_v8  ;;  %2415 = vmatpush3.bf16.msra.mxu0 %v2412_v5  ;;  %vm36_vm2 = vcmp.ge.s32.totalorder %v35_v24, 64  ;;  %vm37_vm3 = vcmp.lt.s32.totalorder %v35_v24, 96  ;;  %v43_v55 = vld [vmem:[%s3095_s0 + $0x20] sm:$0xff]  ;;  %v45_v57 = vld [vmem:[%s3095_s0 + $0x30] sm:$0xff]  ;;  %v46_v58 = vld [vmem:[%s3095_s0 + $0x38] sm:$0xff] }
   0x6   :  { %2419 = vmatprep.subr.bf16.mxu1 %v2654_v0  ;;  %2428 = vmatprep.subr.bf16.mxu0 %v2654_v0  ;;  %vm2765_vm4 = vmand %vm36_vm2, %vm37_vm3 }
   0x8   :  { %2205 = vmatmul.mubr.msk.f32.vlgmr.msra.gmra.mrb[0].mxu0 %vm56_vm0, %v40_v11 }
   0x9   :  { %2421 = vmatpush3.bf16.msra.mxu1 %v2741_v12  ;;  %2430 = vmatpush3.bf16.msra.mxu0 %v2728_v8 }
   0xa   :  { %2422 = vmatprep.subr.bf16.mxu1 %v2654_v0  ;;  %2431 = vmatprep.subr.bf16.mxu0 %v2654_v0 }
   0xb   :  { %2207 = vmatprep.mubr.msk.f32.mxu0 %vm56_vm0, %v41_v53 }
   0xc   :  { %2225 = vmatmul.mubr.f32.vlgmr.msra.gmra.mrb[0].mxu1 %v2656_v4  ;;  %2208 = vmatmul.mubr.msk.f32.gmra.mrb[2].mxu0 %vm56_vm0, %v42_v54 }
   0xd   :  { %2424 = vmatpush3.bf16.msra.mxu1 %v2728_v8  ;;  %2235 = vmatprep.mubr.msk.f32.mxu1 %vm2655_vm1, %v2656_v4 }
   0xe   :  { %2425 = vmatprep.subr.bf16.mxu1 %v2654_v0  ;;  %2433 = vmatpush3.bf16.msra.mxu0 %v2741_v12 }
   0xf   :  { %2440 = vmatprep.subr.bf16.mxu0 %v2654_v0  ;;  %2210 = vmatprep.mubr.msk.f32.mxu0 %vm56_vm0, %v43_v55 }
  0x10   :  { %2211 = vmatmul.mubr.msk.f32.gmra.mrb[4].mxu0 %vm56_vm0, %v44_v56 }
  0x11   :  { %2427 = vmatpush3.bf16.msra.mxu1 %v2741_v12  ;;  %2213 = vmatprep.mubr.msk.f32.mxu0 %vm56_vm0, %v45_v57 }
  0x12   :  { %2434 = vmatprep.subr.bf16.mxu1 %v2654_v0 }
  0x14   :  { %2214 = vmatmul.mubr.msk.f32.gmra.mrb[6].mxu0 %vm56_vm0, %v46_v58 }
  0x15   :  { %2246 = vmatprep.mubr.msk.f32.mxu0 %vm2655_vm1, %v2656_v4 }
  0xdb   :  { %v2206_v14 = vpop.f32.mrb[0].mxu0 }
  0xdc   :  { %v147_v15 = vpop.f32.mrb[1].mxu0  ;;  %v153_v38 = vadd.f32 %v2206_v14, %v2762_v13 }
  0xdd   :  { %v148_v16 = vadd.f32 %v2762_v13, %v147_v15 }
  0xdf   :  { %v269_v17 = vpop.f32.mrb[0].mxu1  ;;  %v2209_v62 = vpop.f32.mrb[2].mxu0 }
  0xe0   :  { %v273_v18 = vadd.f32 %v269_v17, %v148_v16  ;;  %v2226_v19 = vpop.f32.mrb[1].mxu1  ;;  %v157_v63 = vpop.f32.mrb[3].mxu0 }
  0xe1   :  { %v158_v7 = vadd.f32 %v2762_v13, %v157_v63 }
  0xe2   :  { %v2057_v20 = vmul.f32 -1.442695, %v273_v18 }
  0xe3   :  { %v2816_v1 = vpop.f32.mrb[4].mxu0 }
  0xe4   :  { %2526 = vpow2.f32 %v2057_v20  ;;  %v2818_v2 = vpop.f32.mrb[5].mxu0 }
  0xe5   :  { %2528 = vtanh.f32 %v273_v18 }
  0xe7   :  { %v2820_v3 = vpop.f32.mrb[6].mxu0 }
  0xe8   :  { %v2822_v5 = vpop.f32.mrb[7].mxu0 }
  0xee   :  { %v2527_v21 = vpop.eup %2526 }
  0xef   :  { %v278_v23 = vadd.f32 1.0, %v2527_v21  ;;  %v2529_v26 = vpop.eup %2528 }
  0xf1   :  { %2530 = vrcp.f32 %v278_v23 }
  0xfb   :  { %v2531_v27 = vpop.eup %2530 }
  0xfc   :  { %v281_v28 = vsel %vm2765_vm4, %v2529_v26, %v2531_v27 }
  0xfd   :  { %284 = vrot.lane.b32.xlu0 %v281_v28, %s2657_s5  ;;  %v282_v31 = vmul.f32 0.0, %v281_v28 }
 0x16f   :  { %v285_v29 = vpop.permute.xlu0 %284 }
 0x170   :  { %v287_v30 = vmul.f32 %v285_v29, %v281_v28 }
 0x172   :  { %289 = vrot.lane.b32.xlu0 %v287_v30, %s2658_s25  ;;  %v163_v30 = vadd.f32 %v2209_v62, %v2762_v13 }
 0x1e4   :  { %v290_v32 = vpop.permute.xlu0 %289 }
 0x1e5   :  { %v292_v33 = vadd.f32 %v290_v32, %v282_v31 }
 0x1e7   :  { %2532 = vtanh.f32 %v292_v33 }
 0x1f1   :  { %v2533_v34 = vpop.eup %2532 }
 0x1f2   :  { %295 = vrot.lane.b32.xlu1 %v2533_v34, %s2657_s5 }
 0x264   :  { %v296_v35 = vpop.permute.xlu1 %295 }
 0x265   :  { %v298_v36 = vmul.f32 %v296_v35, %v281_v28 }
 0x267   :  { %300 = vrot.lane.b32.xlu1 %v298_v36, %s2658_s25 }
 0x2d9   :  { %v301_v37 = vpop.permute.xlu1 %300 }
 0x2da   :  { %303 = vst.msk [vmem:[#allocation3] sm:$0xff] %vm199_vm5, %v301_v37  ;;  %2236 = vmatmul.mubr.msk.f32.vlgmr.msra.gmra.mrb[2].mxu1 %vm199_vm5, %v301_v37 }
 0x2db   :  { %2436 = vmatpush3.bf16.msra.mxu1 %v2728_v8  ;;  %2257 = vmatprep.mubr.msk.f32.mxu1 %vm2655_vm1, %v2656_v4 }
 0x2dc   :  { %2437 = vmatprep.subr.bf16.mxu1 %v2654_v0 }
 0x2df   :  { %2439 = vmatpush3.bf16.msra.mxu1 %v2741_v12 }
 0x2e0   :  { %2446 = vmatprep.subr.bf16.mxu1 %v2654_v0 }
 0x3ad   :  { %v374_v39 = vpop.f32.mrb[2].mxu1 }
 0x3ae   :  { %v378_v40 = vadd.f32 %v374_v39, %v153_v38  ;;  %v2237_v41 = vpop.f32.mrb[3].mxu1 }
 0x3b0   :  { %v2059_v42 = vmul.f32 -1.442695, %v378_v40 }
 0x3b2   :  { %2534 = vpow2.f32 %v2059_v42 }
 0x3b3   :  { %2536 = vtanh.f32 %v378_v40 }
 0x3bc   :  { %v2535_v43 = vpop.eup %2534 }
 0x3bd   :  { %v383_v44 = vadd.f32 1.0, %v2535_v43  ;;  %v2537_v45 = vpop.eup %2536 }
 0x3bf   :  { %2538 = vrcp.f32 %v383_v44 }
 0x3c9   :  { %v2539_v46 = vpop.eup %2538 }
 0x3ca   :  { %v386_v47 = vsel %vm2765_vm4, %v2537_v45, %v2539_v46 }
 0x3cb   :  { %389 = vrot.lane.b32.xlu0 %v386_v47, %s2657_s5  ;;  %v387_v50 = vmul.f32 %v386_v47, %v292_v33 }
 0x43d   :  { %v390_v48 = vpop.permute.xlu0 %389 }
 0x43e   :  { %v392_v49 = vmul.f32 %v390_v48, %v386_v47 }
 0x440   :  { %394 = vrot.lane.b32.xlu1 %v392_v49, %s2658_s25  ;;  %v168_v49 = vadd.f32 %v2762_v13, %v2818_v2 }
 0x4b2   :  { %v395_v51 = vpop.permute.xlu1 %394 }
 0x4b3   :  { %v397_v52 = vadd.f32 %v395_v51, %v387_v50 }
 0x4b5   :  { %2540 = vtanh.f32 %v397_v52 }
 0x4bf   :  { %v2541_v59 = vpop.eup %2540 }
 0x4c0   :  { %400 = vrot.lane.b32.xlu0 %v2541_v59, %s2657_s5 }
 0x532   :  { %v401_v60 = vpop.permute.xlu0 %400 }
 0x533   :  { %v403_v61 = vmul.f32 %v401_v60, %v386_v47 }
 0x535   :  { %405 = vrot.lane.b32.xlu1 %v403_v61, %s2658_s25 }
 0x5a7   :  { %v406_v6 = vpop.permute.xlu1 %405 }
 0x5a8   :  { %409 = vst.msk [vmem:[#allocation3 + $0x8] sm:$0xff] %vm199_vm5, %v406_v6  ;;  %2247 = vmatmul.mubr.msk.f32.vlgmr.msra.gmra.mrb[8].mxu0 %vm199_vm5, %v406_v6 }
 0x5a9   :  { %2442 = vmatpush3.bf16.msra.mxu0 %v2728_v8  ;;  %2268 = vmatprep.mubr.msk.f32.mxu0 %vm2655_vm1, %v2656_v4 }
 0x5aa   :  { %2443 = vmatprep.subr.bf16.mxu0 %v2654_v0 }
 0x5ad   :  { %2445 = vmatpush3.bf16.msra.mxu0 %v2741_v12 }
 0x5ae   :  { %2452 = vmatprep.subr.bf16.mxu0 %v2654_v0 }
 0x67b   :  { %v480_v9 = vpop.f32.mrb[8].mxu0 }
 0x67c   :  { %v484_v10 = vadd.f32 %v480_v9, %v158_v7  ;;  %v2248_v11 = vpop.f32.mrb[9].mxu0 }
 0x67e   :  { %v2061_v14 = vmul.f32 -1.442695, %v484_v10 }
 0x680   :  { %2542 = vpow2.f32 %v2061_v14 }
 0x681   :  { %2544 = vtanh.f32 %v484_v10  ;;  %v173_v10 = vadd.f32 %v2816_v1, %v2762_v13 }
 0x68a   :  { %v2543_v15 = vpop.eup %2542 }
 0x68b   :  { %v489_v16 = vadd.f32 1.0, %v2543_v15  ;;  %v2545_v17 = vpop.eup %2544 }
 0x68d   :  { %2546 = vrcp.f32 %v489_v16 }
 0x697   :  { %v2547_v18 = vpop.eup %2546 }
 0x698   :  { %v492_v19 = vsel %vm2765_vm4, %v2545_v17, %v2547_v18 }
 0x699   :  { %495 = vrot.lane.b32.xlu0 %v492_v19, %s2657_s5  ;;  %v493_v22 = vmul.f32 %v492_v19, %v397_v52 }
 0x70b   :  { %v496_v20 = vpop.permute.xlu0 %495 }
 0x70c   :  { %v498_v21 = vmul.f32 %v496_v20, %v492_v19 }
 0x70e   :  { %500 = vrot.lane.b32.xlu1 %v498_v21, %s2658_s25 }
 0x780   :  { %v501_v23 = vpop.permute.xlu1 %500 }
 0x781   :  { %v503_v24 = vadd.f32 %v501_v23, %v493_v22 }
 0x783   :  { %2548 = vtanh.f32 %v503_v24 }
 0x78d   :  { %v2549_v26 = vpop.eup %2548 }
 0x78e   :  { %506 = vrot.lane.b32.xlu0 %v2549_v26, %s2657_s5  ;;  %v1055_v26 = vld [vmem:[%s3097_s2 + $0x8] sm:$0xff] }
 0x800   :  { %v507_v27 = vpop.permute.xlu0 %506 }
 0x801   :  { %v509_v28 = vmul.f32 %v507_v27, %v492_v19 }
 0x803   :  { %511 = vrot.lane.b32.xlu1 %v509_v28, %s2658_s25 }
 0x875   :  { %v512_v29 = vpop.permute.xlu1 %511 }
 0x876   :  { %515 = vst.msk [vmem:[#allocation3 + $0x10] sm:$0xff] %vm199_vm5, %v512_v29  ;;  %2258 = vmatmul.mubr.msk.f32.vlgmr.msra.gmra.mrb[4].mxu1 %vm199_vm5, %v512_v29 }
 0x877   :  { %2448 = vmatpush3.bf16.msra.mxu1 %v2728_v8  ;;  %2279 = vmatprep.mubr.msk.f32.mxu1 %vm2655_vm1, %v2656_v4 }
 0x878   :  { %2449 = vmatprep.subr.bf16.mxu1 %v2654_v0 }
 0x87b   :  { %2451 = vmatpush3.bf16.msra.mxu1 %v2741_v12 }
 0x87c   :  { %2458 = vmatprep.subr.bf16.mxu1 %v2654_v0 }
 0x949   :  { %v586_v31 = vpop.f32.mrb[4].mxu1 }
 0x94a   :  { %v590_v32 = vadd.f32 %v586_v31, %v163_v30  ;;  %v2259_v33 = vpop.f32.mrb[5].mxu1  ;;  %v1056_v31 = vld [vmem:[%s3097_s2 + $0x10] sm:$0xff] }
 0x94c   :  { %v2063_v34 = vmul.f32 -1.442695, %v590_v32 }
 0x94e   :  { %2550 = vpow2.f32 %v2063_v34 }
 0x94f   :  { %2552 = vtanh.f32 %v590_v32  ;;  %v1057_v32 = vld [vmem:[%s3097_s2 + $0x18] sm:$0xff] }
 0x950   :  { %v2468_v33 = vpack.c.bf16 %v1057_v32, %v1056_v31 }
 0x958   :  { %v2551_v35 = vpop.eup %2550 }
 0x959   :  { %v595_v36 = vadd.f32 1.0, %v2551_v35  ;;  %v2553_v37 = vpop.eup %2552  ;;  %v1046_v35 = vld [vmem:[#allocation3] sm:$0xff] }
 0x95b   :  { %2554 = vrcp.f32 %v595_v36  ;;  %v1047_v36 = vld [vmem:[#allocation3 + $0x8] sm:$0xff] }
 0x965   :  { %v2555_v38 = vpop.eup %2554 }
 0x966   :  { %v598_v39 = vsel %vm2765_vm4, %v2553_v37, %v2555_v38  ;;  %v1048_v37 = vld [vmem:[#allocation3 + $0x10] sm:$0xff] }
 0x967   :  { %601 = vrot.lane.b32.xlu0 %v598_v39, %s2657_s5  ;;  %v599_v42 = vmul.f32 %v598_v39, %v503_v24  ;;  %v1054_v24 = vld [vmem:[%s3097_s2] sm:$0xff] }
 0x968   :  { %v2464_v27 = vpack.c.bf16 %v1055_v26, %v1054_v24 }
 0x9d9   :  { %v602_v40 = vpop.permute.xlu0 %601 }
 0x9da   :  { %v604_v41 = vmul.f32 %v602_v40, %v598_v39 }
 0x9dc   :  { %606 = vrot.lane.b32.xlu1 %v604_v41, %s2658_s25  ;;  %v178_v41 = vadd.f32 %v2762_v13, %v2822_v5 }
 0xa4e   :  { %v607_v43 = vpop.permute.xlu1 %606 }
 0xa4f   :  { %v609_v44 = vadd.f32 %v607_v43, %v599_v42 }
 0xa51   :  { %2556 = vtanh.f32 %v609_v44 }
 0xa5b   :  { %v2557_v45 = vpop.eup %2556 }
 0xa5c   :  { %612 = vrot.lane.b32.xlu0 %v2557_v45, %s2657_s5 }
 0xace   :  { %v613_v46 = vpop.permute.xlu0 %612 }
 0xacf   :  { %v615_v47 = vmul.f32 %v613_v46, %v598_v39 }
 0xad1   :  { %617 = vrot.lane.b32.xlu1 %v615_v47, %s2658_s25 }
 0xb43   :  { %v618_v48 = vpop.permute.xlu1 %617 }
 0xb44   :  { %621 = vst.msk [vmem:[#allocation3 + $0x18] sm:$0xff] %vm199_vm5, %v618_v48  ;;  %2269 = vmatmul.mubr.msk.f32.vlgmr.msra.gmra.mrb[10].mxu0 %vm199_vm5, %v618_v48 }
 0xb45   :  { %2454 = vmatpush3.bf16.msra.mxu0 %v2728_v8  ;;  %2290 = vmatprep.mubr.msk.f32.mxu0 %vm2655_vm1, %v2656_v4 }
 0xb46   :  { %2455 = vmatprep.subr.bf16.mxu0 %v2654_v0 }
 0xb49   :  { %2457 = vmatpush3.bf16.msra.mxu0 %v2741_v12 }
 0xb4a   :  { %2465 = vmatprep.subr.bf16.mxu0 %v2464_v27 }
 0xb4b   :  { %v1049_v38 = vld [vmem:[#allocation3 + $0x18] sm:$0xff] }
 0xc17   :  { %v692_v50 = vpop.f32.mrb[10].mxu0 }
 0xc18   :  { %v696_v51 = vadd.f32 %v692_v50, %v168_v49  ;;  %v2270_v52 = vpop.f32.mrb[11].mxu0 }
 0xc1a   :  { %v2065_v53 = vmul.f32 -1.442695, %v696_v51 }
 0xc1c   :  { %2558 = vpow2.f32 %v2065_v53 }
 0xc1d   :  { %2560 = vtanh.f32 %v696_v51 }
 0xc26   :  { %v2559_v54 = vpop.eup %2558 }
 0xc27   :  { %v701_v55 = vadd.f32 1.0, %v2559_v54  ;;  %v2561_v56 = vpop.eup %2560 }
 0xc29   :  { %2562 = vrcp.f32 %v701_v55 }
 0xc33   :  { %v2563_v57 = vpop.eup %2562 }
 0xc34   :  { %v704_v58 = vsel %vm2765_vm4, %v2561_v56, %v2563_v57 }
 0xc35   :  { %707 = vrot.lane.b32.xlu0 %v704_v58, %s2657_s5  ;;  %v705_v61 = vmul.f32 %v704_v58, %v609_v44 }
 0xca7   :  { %v708_v59 = vpop.permute.xlu0 %707 }
 0xca8   :  { %v710_v60 = vmul.f32 %v708_v59, %v704_v58 }
 0xcaa   :  { %712 = vrot.lane.b32.xlu1 %v710_v60, %s2658_s25 }
 0xd1c   :  { %v713_v62 = vpop.permute.xlu1 %712 }
 0xd1d   :  { %v715_v63 = vadd.f32 %v713_v62, %v705_v61  ;;  %v1202_v62 = vld [vmem:[%s3098_s4] sm:$0xff] }
 0xd1f   :  { %2564 = vtanh.f32 %v715_v63 }
 0xd29   :  { %v2565_v2 = vpop.eup %2564 }
 0xd2a   :  { %718 = vrot.lane.b32.xlu0 %v2565_v2, %s2657_s5 }
 0xd9c   :  { %v719_v6 = vpop.permute.xlu0 %718 }
 0xd9d   :  { %v721_v7 = vmul.f32 %v719_v6, %v704_v58  ;;  %v1204_v6 = vld [vmem:[%s3098_s4 + $0x10] sm:$0xff] }
 0xd9f   :  { %723 = vrot.lane.b32.xlu1 %v721_v7, %s2658_s25  ;;  %v1205_v7 = vld [vmem:[%s3098_s4 + $0x18] sm:$0xff] }
 0xe11   :  { %v724_v9 = vpop.permute.xlu1 %723 }
 0xe12   :  { %727 = vst.msk [vmem:[#allocation3 + $0x20] sm:$0xff] %vm199_vm5, %v724_v9  ;;  %2280 = vmatmul.mubr.msk.f32.vlgmr.msra.gmra.mrb[6].mxu1 %vm199_vm5, %v724_v9  ;;  %v2942_v9 = vpack.c.bf16 %v1205_v7, %v1204_v6 }
 0xe13   :  { %2460 = vmatpush3.bf16.msra.mxu1 %v2728_v8  ;;  %2301 = vmatprep.mubr.msk.f32.mxu1 %vm2655_vm1, %v2656_v4 }
 0xe14   :  { %2461 = vmatprep.subr.bf16.mxu1 %v2654_v0 }
 0xe17   :  { %2463 = vmatpush3.bf16.msra.mxu1 %v2741_v12 }
 0xe18   :  { %2472 = vmatprep.subr.bf16.mxu1 %v2654_v0 }
 0xe19   :  { %v1050_v39 = vld [vmem:[#allocation3 + $0x20] sm:$0xff] }
 0xee5   :  { %v798_v11 = vpop.f32.mrb[6].mxu1 }
 0xee6   :  { %v802_v14 = vadd.f32 %v798_v11, %v173_v10  ;;  %v2281_v15 = vpop.f32.mrb[7].mxu1 }
 0xee8   :  { %v2067_v16 = vmul.f32 -1.442695, %v802_v14 }
 0xeea   :  { %2566 = vpow2.f32 %v2067_v16  ;;  %v183_v16 = vadd.f32 %v2820_v3, %v2762_v13 }
 0xeeb   :  { %2568 = vtanh.f32 %v802_v14 }
 0xef4   :  { %v2567_v17 = vpop.eup %2566 }
 0xef5   :  { %v807_v18 = vadd.f32 1.0, %v2567_v17  ;;  %v2569_v8 = vpop.eup %2568 }
 0xef7   :  { %2570 = vrcp.f32 %v807_v18 }
 0xf01   :  { %v2571_v19 = vpop.eup %2570 }
 0xf02   :  { %v810_v20 = vsel %vm2765_vm4, %v2569_v8, %v2571_v19  ;;  %v2968_v19 = vld [vmem:[%s3099_s6] ss:$0 sm:$0xff] }
 0xf03   :  { %813 = vrot.lane.b32.xlu0 %v810_v20, %s2657_s5  ;;  %v811_v1 = vmul.f32 %v810_v20, %v715_v63  ;;  %v1203_v63 = vld [vmem:[%s3098_s4 + $0x8] sm:$0xff] }
 0xf04   :  { %v2932_v2 = vpack.c.bf16 %v1203_v63, %v1202_v62 }
 0xf75   :  { %v814_v12 = vpop.permute.xlu0 %813 }
 0xf76   :  { %v816_v21 = vmul.f32 %v814_v12, %v810_v20 }
 0xf78   :  { %818 = vrot.lane.b32.xlu1 %v816_v21, %s2658_s25 }
 0xfea   :  { %v819_v22 = vpop.permute.xlu1 %818 }
 0xfeb   :  { %v821_v23 = vadd.f32 %v819_v22, %v811_v1 }
 0xfed   :  { %2572 = vtanh.f32 %v821_v23 }
 0xff7   :  { %v2573_v28 = vpop.eup %2572 }
 0xff8   :  { %824 = vrot.lane.b32.xlu0 %v2573_v28, %s2657_s5 }
0x106a   :  { %v825_v29 = vpop.permute.xlu0 %824 }
0x106b   :  { %v827_v30 = vmul.f32 %v825_v29, %v810_v20 }
0x106d   :  { %829 = vrot.lane.b32.xlu1 %v827_v30, %s2658_s25 }
0x10df   :  { %v830_v34 = vpop.permute.xlu1 %829 }
0x10e0   :  { %833 = vst.msk [vmem:[#allocation3 + $0x28] sm:$0xff] %vm199_vm5, %v830_v34  ;;  %2291 = vmatmul.mubr.msk.f32.vlgmr.msra.gmra.mrb[12].mxu0 %vm199_vm5, %v830_v34 }
0x10e1   :  { %2467 = vmatpush3.bf16.msra.mxu0 %v2464_v27  ;;  %2312 = vmatprep.mubr.msk.f32.mxu0 %vm199_vm5, %v1046_v35 }
0x10e2   :  { %2469 = vmatprep.subr.bf16.mxu0 %v2468_v33 }
0x10e5   :  { %2471 = vmatpush3.bf16.msra.mxu0 %v2468_v33 }
0x10e6   :  { %2484 = vmatprep.subr.bf16.mxu0 %v2654_v0 }
0x10e7   :  { %v1051_v40 = vld [vmem:[#allocation3 + $0x28] sm:$0xff] }
0x10e8   :  { %2313 = vmatmul.mubr.msk.f32.vlgmr.msra.gmra.mrb[14].mxu0 %vm199_vm5, %v1047_v36 }
0x10e9   :  { %2315 = vmatprep.mubr.msk.f32.mxu0 %vm199_vm5, %v1048_v37  ;;  %2486 = vmatpush3.bf16.msra.mxu0 %v2932_v2 }
0x10ea   :  { %2487 = vmatprep.subr.bf16.mxu0 %v2654_v0 }
0x10ec   :  { %2316 = vmatmul.mubr.msk.f32.gmra.mrb[16].mxu0 %vm199_vm5, %v1049_v38 }
0x10ed   :  { %2318 = vmatprep.mubr.msk.f32.mxu0 %vm199_vm5, %v1050_v39  ;;  %2489 = vmatpush3.bf16.msra.mxu0 %v2942_v9 }
0x10ee   :  { %2496 = vmatprep.subr.bf16.mxu0 %v2654_v0 }
0x10f0   :  { %2319 = vmatmul.mubr.msk.f32.gmra.mrb[18].mxu0 %vm199_vm5, %v1051_v40 }
0x11b3   :  { %v904_v42 = vpop.f32.mrb[12].mxu0 }
0x11b4   :  { %v908_v43 = vadd.f32 %v904_v42, %v178_v41  ;;  %v2292_v44 = vpop.f32.mrb[13].mxu0 }
0x11b6   :  { %v2069_v45 = vmul.f32 -1.442695, %v908_v43 }
0x11b8   :  { %2574 = vpow2.f32 %v2069_v45 }
0x11b9   :  { %2576 = vtanh.f32 %v908_v43 }
0x11bb   :  { %v2908_v46 = vpop.f32.mrb[14].mxu0 }
0x11bc   :  { %v1155_v47 = vpop.f32.mrb[15].mxu0 }
0x11bd   :  { %v1156_v20 = vadd.f32 %v2968_v19, %v1155_v47 }
0x11bf   :  { %v2910_v48 = vpop.f32.mrb[16].mxu0 }
0x11c0   :  { %v2912_v49 = vpop.f32.mrb[17].mxu0 }
0x11c2   :  { %v2575_v50 = vpop.eup %2574 }
0x11c3   :  { %v913_v51 = vadd.f32 1.0, %v2575_v50  ;;  %v2914_v52 = vpop.f32.mrb[18].mxu0  ;;  %v2577_v5 = vpop.eup %2576 }
0x11c4   :  { %v2916_v53 = vpop.f32.mrb[19].mxu0 }
0x11c5   :  { %2578 = vrcp.f32 %v913_v51 }
0x11cf   :  { %v2579_v54 = vpop.eup %2578 }
0x11d0   :  { %v916_v55 = vsel %vm2765_vm4, %v2577_v5, %v2579_v54  ;;  %v1161_v54 = vadd.f32 %v2908_v46, %v2968_v19 }
0x11d1   :  { %919 = vrot.lane.b32.xlu0 %v916_v55, %s2657_s5  ;;  %v917_v58 = vmul.f32 %v916_v55, %v821_v23 }
0x1243   :  { %v920_v56 = vpop.permute.xlu0 %919 }
0x1244   :  { %v922_v57 = vmul.f32 %v920_v56, %v916_v55 }
0x1246   :  { %924 = vrot.lane.b32.xlu1 %v922_v57, %s2658_s25 }
0x12b8   :  { %v925_v59 = vpop.permute.xlu1 %924 }
0x12b9   :  { %v2922_v60 = vadd.f32 %v925_v59, %v917_v58 }
0x12bb   :  { %2580 = vtanh.f32 %v2922_v60 }
0x12c5   :  { %v2581_v61 = vpop.eup %2580 }
0x12c6   :  { %930 = vrot.lane.b32.xlu0 %v2581_v61, %s2657_s5 }
0x1338   :  { %v931_v10 = vpop.permute.xlu0 %930 }
0x1339   :  { %v933_v11 = vmul.f32 %v931_v10, %v916_v55 }
0x133b   :  { %935 = vrot.lane.b32.xlu1 %v933_v11, %s2658_s25 }
0x13ad   :  { %v936_v14 = vpop.permute.xlu1 %935 }
0x13ae   :  { %939 = vst.msk [vmem:[#allocation3 + $0x30] sm:$0xff] %vm199_vm5, %v936_v14  ;;  %2302 = vmatmul.mubr.msk.f32.vlgmr.msra.gmra.mrb[8].mxu1 %vm199_vm5, %v936_v14 }
0x13af   :  { %2474 = vmatpush3.bf16.msra.mxu1 %v2932_v2  ;;  %2332 = vmatprep.mubr.msk.f32.mxu1 %vm2655_vm1, %v2656_v4 }
0x13b0   :  { %2475 = vmatprep.subr.bf16.mxu1 %v2654_v0 }
0x13b3   :  { %2477 = vmatpush3.bf16.msra.mxu1 %v2942_v9 }
0x13b4   :  { %2478 = vmatprep.subr.bf16.mxu1 %v2654_v0 }
0x13b5   :  { %v1052_v15 = vld [vmem:[#allocation3 + $0x30] sm:$0xff] }
0x13b6   :  { %2333 = vmatmul.mubr.f32.vlgmr.msra.gmra.mrb[10].mxu1 %v2656_v4  ;;  %2321 = vmatprep.mubr.msk.f32.mxu0 %vm199_vm5, %v1052_v15 }
0x13b7   :  { %2480 = vmatpush3.bf16.msra.mxu1 %v2932_v2  ;;  %2343 = vmatprep.mubr.msk.f32.mxu1 %vm2655_vm1, %v2656_v4 }
0x13b8   :  { %2481 = vmatprep.subr.bf16.mxu1 %v2654_v0 }
0x13bb   :  { %2483 = vmatpush3.bf16.msra.mxu1 %v2942_v9 }
0x13bc   :  { %2490 = vmatprep.subr.bf16.mxu1 %v2654_v0 }
0x1481   :  { %v1010_v17 = vpop.f32.mrb[8].mxu1 }
0x1482   :  { %v1014_v18 = vadd.f32 %v1010_v17, %v183_v16  ;;  %v2303_v8 = vpop.f32.mrb[9].mxu1 }
0x1484   :  { %v2071_v29 = vmul.f32 -1.442695, %v1014_v18 }
0x1489   :  { %v1273_v12 = vpop.f32.mrb[10].mxu1 }
0x148a   :  { %v1277_v21 = vadd.f32 %v1273_v12, %v1156_v20  ;;  %v2334_v1 = vpop.f32.mrb[11].mxu1 }
0x148c   :  { %v2081_v22 = vmul.f32 -1.442695, %v1277_v21 }
0x148e   :  { %2582 = vpow2.f32 %v2081_v22 }
0x148f   :  { %2584 = vtanh.f32 %v1277_v21  ;;  %v1166_v21 = vadd.f32 %v2968_v19, %v2912_v49 }
0x1498   :  { %v2583_v23 = vpop.eup %2582 }
0x1499   :  { %v1282_v24 = vadd.f32 1.0, %v2583_v23  ;;  %v2585_v13 = vpop.eup %2584 }
0x149b   :  { %2586 = vrcp.f32 %v1282_v24 }
0x149c   :  { %2588 = vpow2.f32 %v2071_v29 }
0x14a5   :  { %v2587_v3 = vpop.eup %2586 }
0x14a6   :  { %v1285_v26 = vsel %vm2765_vm4, %v2585_v13, %v2587_v3  ;;  %v2589_v30 = vpop.eup %2588 }
0x14a7   :  { %1288 = vrot.lane.b32.xlu0 %v1285_v26, %s2657_s5  ;;  %v1286_v31 = vmul.f32 0.0, %v1285_v26  ;;  %v1019_v32 = vadd.f32 1.0, %v2589_v30 }
0x1519   :  { %v1289_v27 = vpop.permute.xlu0 %1288 }
0x151a   :  { %v1291_v28 = vmul.f32 %v1289_v27, %v1285_v26 }
0x151c   :  { %1293 = vrot.lane.b32.xlu1 %v1291_v28, %s2658_s25 }
0x158e   :  { %v1294_v33 = vpop.permute.xlu1 %1293 }
0x158f   :  { %v1296_v34 = vadd.f32 %v1294_v33, %v1286_v31 }
0x1591   :  { %2590 = vtanh.f32 %v1296_v34 }
0x1592   :  { %2592 = vrcp.f32 %v1019_v32 }
0x1593   :  { %2594 = vtanh.f32 %v1014_v18 }
0x159b   :  { %v2591_v35 = vpop.eup %2590 }
0x159c   :  { %v2593_v36 = vpop.eup %2592  ;;  %1299 = vrot.lane.b32.xlu0 %v2591_v35, %s2657_s5 }
0x159d   :  { %v2595_v37 = vpop.eup %2594 }
0x159e   :  { %v1022_v38 = vsel %vm2765_vm4, %v2595_v37, %v2593_v36  ;;  %v1171_v37 = vadd.f32 %v2910_v48, %v2968_v19 }
0x159f   :  { %v1023_v44 = vmul.f32 %v1022_v38, %v2922_v60 }
0x15a0   :  { %1025 = vrot.lane.b32.xlu0 %v1022_v38, %s2657_s5 }
0x160e   :  { %v1300_v39 = vpop.permute.xlu0 %1299 }
0x160f   :  { %v1302_v40 = vmul.f32 %v1300_v39, %v1285_v26 }
0x1611   :  { %1305 = vrot.lane.b32.xlu1 %v1302_v40, %s2658_s25 }
0x1612   :  { %v1026_v41 = vpop.permute.xlu0 %1025 }
0x1613   :  { %v1028_v42 = vmul.f32 %v1026_v41, %v1022_v38 }
0x1615   :  { %1030 = vrot.lane.b32.xlu0 %v1028_v42, %s2658_s25 }
0x1683   :  { %v1306_v43 = vpop.permute.xlu1 %1305 }
0x1684   :  { %2344 = vmatmul.mubr.msk.f32.vlgmr.msra.gmra.mrb[12].mxu1 %vm199_vm5, %v1306_v43 }
0x1685   :  { %2492 = vmatpush3.bf16.msra.mxu1 %v2932_v2  ;;  %2365 = vmatprep.mubr.msk.f32.mxu1 %vm2655_vm1, %v2656_v4 }
0x1686   :  { %2493 = vmatprep.subr.bf16.mxu1 %v2654_v0 }
0x1687   :  { %v1031_v45 = vpop.permute.xlu0 %1030 }
0x1688   :  { %v1033_v47 = vadd.f32 %v1031_v45, %v1023_v44 }
0x1689   :  { %2495 = vmatpush3.bf16.msra.mxu1 %v2942_v9 }
0x168a   :  { %2596 = vtanh.f32 %v1033_v47  ;;  %2502 = vmatprep.subr.bf16.mxu1 %v2654_v0 }
0x1694   :  { %v2597_v50 = vpop.eup %2596 }
0x1695   :  { %1036 = vrot.lane.b32.xlu0 %v2597_v50, %s2657_s5 }
0x1707   :  { %v1037_v51 = vpop.permute.xlu0 %1036 }
0x1708   :  { %v1039_v5 = vmul.f32 %v1037_v51, %v1022_v38 }
0x170a   :  { %1041 = vrot.lane.b32.xlu0 %v1039_v5, %s2658_s25 }
0x1757   :  { %v1375_v55 = vpop.f32.mrb[12].mxu1 }
0x1758   :  { %v1379_v56 = vadd.f32 %v1375_v55, %v1161_v54  ;;  %v2345_v57 = vpop.f32.mrb[13].mxu1 }
0x175a   :  { %v2083_v58 = vmul.f32 -1.442695, %v1379_v56 }
0x175c   :  { %2598 = vpow2.f32 %v2083_v58 }
0x175d   :  { %2600 = vtanh.f32 %v1379_v56 }
0x1766   :  { %v2599_v59 = vpop.eup %2598 }
0x1767   :  { %v1384_v60 = vadd.f32 1.0, %v2599_v59  ;;  %v2601_v61 = vpop.eup %2600  ;;  %v1176_v59 = vadd.f32 %v2968_v19, %v2916_v53 }
0x1769   :  { %2602 = vrcp.f32 %v1384_v60 }
0x1773   :  { %v2603_v62 = vpop.eup %2602 }
0x1774   :  { %v1387_v63 = vsel %vm2765_vm4, %v2601_v61, %v2603_v62 }
0x1775   :  { %1390 = vrot.lane.b32.xlu1 %v1387_v63, %s2657_s5  ;;  %v1388_v15 = vmul.f32 %v1387_v63, %v1296_v34 }
0x177c   :  { %v1042_v6 = vpop.permute.xlu0 %1041 }
0x177d   :  { %1045 = vst.msk [vmem:[#allocation3 + $0x38] sm:$0xff] %vm199_vm5, %v1042_v6 }
0x1784   :  { %v1053_v46 = vld [vmem:[#allocation3 + $0x38] sm:$0xff] }
0x1785   :  { %2322 = vmatmul.mubr.msk.f32.gmra.mrb[20].mxu0 %vm199_vm5, %v1053_v46 }
0x1786   :  { %2354 = vmatprep.mubr.msk.f32.mxu0 %vm2655_vm1, %v2656_v4 }
0x17e7   :  { %v1391_v7 = vpop.permute.xlu1 %1390 }
0x17e8   :  { %v1393_v10 = vmul.f32 %v1391_v7, %v1387_v63 }
0x17ea   :  { %1395 = vrot.lane.b32.xlu1 %v1393_v10, %s2658_s25 }
0x1858   :  { %v3001_v11 = vpop.f32.mrb[20].mxu0 }
0x1859   :  { %v3003_v14 = vpop.f32.mrb[21].mxu0 }
0x185c   :  { %v1396_v16 = vpop.permute.xlu1 %1395 }
0x185d   :  { %v1398_v17 = vadd.f32 %v1396_v16, %v1388_v15 }
0x185f   :  { %2604 = vtanh.f32 %v1398_v17 }
0x1869   :  { %v2605_v18 = vpop.eup %2604 }
0x186a   :  { %1401 = vrot.lane.b32.xlu1 %v2605_v18, %s2657_s5 }
0x18dc   :  { %v1402_v8 = vpop.permute.xlu1 %1401 }
0x18dd   :  { %v1404_v20 = vmul.f32 %v1402_v8, %v1387_v63 }
0x18df   :  { %1407 = vrot.lane.b32.xlu1 %v1404_v20, %s2658_s25 }
0x1951   :  { %v1408_v12 = vpop.permute.xlu1 %1407 }
0x1952   :  { %2355 = vmatmul.mubr.msk.f32.vlgmr.msra.gmra.mrb[22].mxu0 %vm199_vm5, %v1408_v12 }
0x1953   :  { %2498 = vmatpush3.bf16.msra.mxu0 %v2932_v2  ;;  %2376 = vmatprep.mubr.msk.f32.mxu0 %vm2655_vm1, %v2656_v4 }
0x1954   :  { %2499 = vmatprep.subr.bf16.mxu0 %v2654_v0 }
0x1957   :  { %2501 = vmatpush3.bf16.msra.mxu0 %v2942_v9 }
0x1958   :  { %2508 = vmatprep.subr.bf16.mxu0 %v2654_v0 }
0x1a25   :  { %v1477_v1 = vpop.f32.mrb[22].mxu0 }
0x1a26   :  { %v1481_v22 = vadd.f32 %v1477_v1, %v1166_v21  ;;  %v2356_v23 = vpop.f32.mrb[23].mxu0 }
0x1a28   :  { %v2085_v24 = vmul.f32 -1.442695, %v1481_v22 }
0x1a2a   :  { %2606 = vpow2.f32 %v2085_v24 }
0x1a2b   :  { %2608 = vtanh.f32 %v1481_v22  ;;  %v1181_v22 = vadd.f32 %v2914_v52, %v2968_v19 }
0x1a34   :  { %v2607_v13 = vpop.eup %2606 }
0x1a35   :  { %v1486_v3 = vadd.f32 1.0, %v2607_v13  ;;  %v2609_v26 = vpop.eup %2608 }
0x1a37   :  { %2610 = vrcp.f32 %v1486_v3 }
0x1a41   :  { %v2611_v27 = vpop.eup %2610 }
0x1a42   :  { %v1489_v28 = vsel %vm2765_vm4, %v2609_v26, %v2611_v27 }
0x1a43   :  { %1492 = vrot.lane.b32.xlu0 %v1489_v28, %s2657_s5  ;;  %v1490_v49 = vmul.f32 %v1489_v28, %v1398_v17 }
0x1ab5   :  { %v1493_v29 = vpop.permute.xlu0 %1492 }
0x1ab6   :  { %v1495_v30 = vmul.f32 %v1493_v29, %v1489_v28 }
0x1ab8   :  { %1497 = vrot.lane.b32.xlu1 %v1495_v30, %s2658_s25 }
0x1b2a   :  { %v1498_v31 = vpop.permute.xlu1 %1497 }
0x1b2b   :  { %v1500_v32 = vadd.f32 %v1498_v31, %v1490_v49 }
0x1b2d   :  { %2612 = vtanh.f32 %v1500_v32 }
0x1b37   :  { %v2613_v33 = vpop.eup %2612 }
0x1b38   :  { %1503 = vrot.lane.b32.xlu0 %v2613_v33, %s2657_s5 }
0x1baa   :  { %v1504_v34 = vpop.permute.xlu0 %1503 }
0x1bab   :  { %v1506_v35 = vmul.f32 %v1504_v34, %v1489_v28  ;;  %v1186_v34 = vadd.f32 %v2968_v19, %v3003_v14 }
0x1bad   :  { %1509 = vrot.lane.b32.xlu1 %v1506_v35, %s2658_s25 }
0x1c1f   :  { %v1510_v36 = vpop.permute.xlu1 %1509 }
0x1c20   :  { %2366 = vmatmul.mubr.msk.f32.vlgmr.msra.gmra.mrb[14].mxu1 %vm199_vm5, %v1510_v36 }
0x1c21   :  { %2504 = vmatpush3.bf16.msra.mxu1 %v2932_v2  ;;  %2387 = vmatprep.mubr.msk.f32.mxu1 %vm2655_vm1, %v2656_v4 }
0x1c22   :  { %2505 = vmatprep.subr.bf16.mxu1 %v2654_v0 }
0x1c25   :  { %2507 = vmatpush3.bf16.msra.mxu1 %v2942_v9 }
0x1c26   :  { %2514 = vmatprep.subr.bf16.mxu1 %v2654_v0 }
0x1cf3   :  { %v1579_v38 = vpop.f32.mrb[14].mxu1 }
0x1cf4   :  { %v1583_v39 = vadd.f32 %v1579_v38, %v1171_v37  ;;  %v2367_v40 = vpop.f32.mrb[15].mxu1 }
0x1cf6   :  { %v2087_v41 = vmul.f32 -1.442695, %v1583_v39 }
0x1cf8   :  { %2614 = vpow2.f32 %v2087_v41 }
0x1cf9   :  { %2616 = vtanh.f32 %v1583_v39 }
0x1d02   :  { %v2615_v42 = vpop.eup %2614 }
0x1d03   :  { %v1588_v43 = vadd.f32 1.0, %v2615_v42  ;;  %v2617_v44 = vpop.eup %2616 }
0x1d05   :  { %2618 = vrcp.f32 %v1588_v43 }
0x1d0f   :  { %v2619_v45 = vpop.eup %2618 }
0x1d10   :  { %v1591_v47 = vsel %vm2765_vm4, %v2617_v44, %v2619_v45 }
0x1d11   :  { %1594 = vrot.lane.b32.xlu0 %v1591_v47, %s2657_s5  ;;  %v1592_v48 = vmul.f32 %v1591_v47, %v1500_v32 }
0x1d83   :  { %v1595_v50 = vpop.permute.xlu0 %1594 }
0x1d84   :  { %v1597_v51 = vmul.f32 %v1595_v50, %v1591_v47 }
0x1d86   :  { %1599 = vrot.lane.b32.xlu1 %v1597_v51, %s2658_s25 }
0x1df8   :  { %v1600_v5 = vpop.permute.xlu1 %1599 }
0x1df9   :  { %v1602_v54 = vadd.f32 %v1600_v5, %v1592_v48 }
0x1dfb   :  { %2620 = vtanh.f32 %v1602_v54 }
0x1e05   :  { %v2621_v55 = vpop.eup %2620 }
0x1e06   :  { %1605 = vrot.lane.b32.xlu0 %v2621_v55, %s2657_s5  ;;  %v1191_v55 = vadd.f32 %v3001_v11, %v2968_v19  ;;  %v2096_v19 = vld [vmem:[%s3100_s7] ss:$0 sm:$0xff] }
0x1e78   :  { %v1606_v56 = vpop.permute.xlu0 %1605 }
0x1e79   :  { %v1608_v57 = vmul.f32 %v1606_v56, %v1591_v47 }
0x1e7b   :  { %1611 = vrot.lane.b32.xlu1 %v1608_v57, %s2658_s25 }
0x1eed   :  { %v1612_v58 = vpop.permute.xlu1 %1611 }
0x1eee   :  { %2377 = vmatmul.mubr.msk.f32.vlgmr.msra.gmra.mrb[24].mxu0 %vm199_vm5, %v1612_v58 }
0x1eef   :  { %2510 = vmatpush3.bf16.msra.mxu0 %v2932_v2  ;;  %2398 = vmatprep.mubr.msk.f32.mxu0 %vm2655_vm1, %v2656_v4 }
0x1ef0   :  { %2511 = vmatprep.subr.bf16.mxu0 %v2654_v0 }
0x1ef3   :  { %2513 = vmatpush3.bf16.msra.mxu0 %v2942_v9 }
0x1fc1   :  { %v1681_v60 = vpop.f32.mrb[24].mxu0 }
0x1fc2   :  { %v1685_v61 = vadd.f32 %v1681_v60, %v1176_v59  ;;  %v2378_v62 = vpop.f32.mrb[25].mxu0 }
0x1fc4   :  { %v2089_v63 = vmul.f32 -1.442695, %v1685_v61 }
0x1fc6   :  { %2622 = vpow2.f32 %v2089_v63 }
0x1fc7   :  { %2624 = vtanh.f32 %v1685_v61 }
0x1fd0   :  { %v2623_v6 = vpop.eup %2622 }
0x1fd1   :  { %v1690_v46 = vadd.f32 1.0, %v2623_v6  ;;  %v2625_v7 = vpop.eup %2624 }
0x1fd3   :  { %2626 = vrcp.f32 %v1690_v46 }
0x1fdd   :  { %v2627_v10 = vpop.eup %2626 }
0x1fde   :  { %v1693_v15 = vsel %vm2765_vm4, %v2625_v7, %v2627_v10 }
0x1fdf   :  { %1696 = vrot.lane.b32.xlu0 %v1693_v15, %s2657_s5  ;;  %v1694_v53 = vmul.f32 %v1693_v15, %v1602_v54 }
0x2051   :  { %v1697_v16 = vpop.permute.xlu0 %1696 }
0x2052   :  { %v1699_v17 = vmul.f32 %v1697_v16, %v1693_v15 }
0x2054   :  { %1701 = vrot.lane.b32.xlu1 %v1699_v17, %s2658_s25 }
0x20c6   :  { %v1702_v18 = vpop.permute.xlu1 %1701 }
0x20c7   :  { %v1704_v8 = vadd.f32 %v1702_v18, %v1694_v53 }
0x20c9   :  { %2628 = vtanh.f32 %v1704_v8 }
0x20d3   :  { %v2629_v20 = vpop.eup %2628 }
0x20d4   :  { %1707 = vrot.lane.b32.xlu0 %v2629_v20, %s2657_s5 }
0x2146   :  { %v1708_v12 = vpop.permute.xlu0 %1707 }
0x2147   :  { %v1710_v21 = vmul.f32 %v1708_v12, %v1693_v15 }
0x2149   :  { %1713 = vrot.lane.b32.xlu1 %v1710_v21, %s2658_s25  ;;  %v2097_v21 = vld [vmem:[#allocation4] ss:$0 sm:$0xff] }
0x21bb   :  { %v1714_v1 = vpop.permute.xlu1 %1713 }
0x21bc   :  { %2388 = vmatmul.mubr.msk.f32.vlgmr.msra.gmra.mrb[16].mxu1 %vm199_vm5, %v1714_v1 }
0x21bd   :  { %2516 = vmatpush3.bf16.msra.mxu1 %v2932_v2  ;;  %2409 = vmatprep.mubr.msk.f32.mxu1 %vm2655_vm1, %v2656_v4 }
0x21be   :  { %2517 = vmatprep.subr.bf16.mxu1 %v2654_v0 }
0x21c1   :  { %2519 = vmatpush3.bf16.msra.mxu1 %v2942_v9 }
0x228f   :  { %v1783_v23 = vpop.f32.mrb[16].mxu1 }
0x2290   :  { %v1787_v24 = vadd.f32 %v1783_v23, %v1181_v22  ;;  %v2389_v13 = vpop.f32.mrb[17].mxu1 }
0x2292   :  { %v2091_v3 = vmul.f32 -1.442695, %v1787_v24 }
0x2294   :  { %2630 = vpow2.f32 %v2091_v3 }
0x2295   :  { %2632 = vtanh.f32 %v1787_v24 }
0x229e   :  { %v2631_v26 = vpop.eup %2630 }
0x229f   :  { %v1792_v27 = vadd.f32 1.0, %v2631_v26  ;;  %v2633_v2 = vpop.eup %2632 }
0x22a1   :  { %2634 = vrcp.f32 %v1792_v27 }
0x22ab   :  { %v2635_v28 = vpop.eup %2634 }
0x22ac   :  { %v1795_v4 = vsel %vm2765_vm4, %v2633_v2, %v2635_v28 }
0x22ad   :  { %1798 = vrot.lane.b32.xlu0 %v1795_v4, %s2657_s5  ;;  %v1796_v52 = vmul.f32 %v1795_v4, %v1704_v8 }
0x231f   :  { %v1799_v0 = vpop.permute.xlu0 %1798 }
0x2320   :  { %v1801_v9 = vmul.f32 %v1799_v0, %v1795_v4 }
0x2322   :  { %1803 = vrot.lane.b32.xlu1 %v1801_v9, %s2658_s25 }
0x2394   :  { %v1804_v29 = vpop.permute.xlu1 %1803 }
0x2395   :  { %v1806_v30 = vadd.f32 %v1804_v29, %v1796_v52 }
0x2397   :  { %2636 = vtanh.f32 %v1806_v30 }
0x23a1   :  { %v2637_v49 = vpop.eup %2636 }
0x23a2   :  { %1809 = vrot.lane.b32.xlu0 %v2637_v49, %s2657_s5 }
0x2414   :  { %v1810_v31 = vpop.permute.xlu0 %1809 }
0x2415   :  { %v1812_v32 = vmul.f32 %v1810_v31, %v1795_v4 }
0x2417   :  { %1815 = vrot.lane.b32.xlu1 %v1812_v32, %s2658_s25 }
0x2489   :  { %v1816_v33 = vpop.permute.xlu1 %1815 }
0x248a   :  { %2399 = vmatmul.mubr.msk.f32.vlgmr.msra.gmra.mrb[26].mxu0 %vm199_vm5, %v1816_v33 }
0x255d   :  { %v1885_v35 = vpop.f32.mrb[26].mxu0 }
0x255e   :  { %v1889_v36 = vadd.f32 %v1885_v35, %v1186_v34  ;;  %v2400_v37 = vpop.f32.mrb[27].mxu0 }
0x2560   :  { %v2093_v38 = vmul.f32 -1.442695, %v1889_v36 }
0x2562   :  { %2638 = vpow2.f32 %v2093_v38 }
0x2563   :  { %2640 = vtanh.f32 %v1889_v36 }
0x256c   :  { %v2639_v39 = vpop.eup %2638 }
0x256d   :  { %v1894_v40 = vadd.f32 1.0, %v2639_v39  ;;  %v2641_v41 = vpop.eup %2640 }
0x256f   :  { %2642 = vrcp.f32 %v1894_v40 }
0x2579   :  { %v2643_v42 = vpop.eup %2642 }
0x257a   :  { %v1897_v43 = vsel %vm2765_vm4, %v2641_v41, %v2643_v42 }
0x257b   :  { %1900 = vrot.lane.b32.xlu0 %v1897_v43, %s2657_s5  ;;  %v1898_v14 = vmul.f32 %v1897_v43, %v1806_v30 }
0x25ed   :  { %v1901_v44 = vpop.permute.xlu0 %1900 }
0x25ee   :  { %v1903_v45 = vmul.f32 %v1901_v44, %v1897_v43 }
0x25f0   :  { %1905 = vrot.lane.b32.xlu1 %v1903_v45, %s2658_s25 }
0x2662   :  { %v1906_v47 = vpop.permute.xlu1 %1905 }
0x2663   :  { %v1908_v50 = vadd.f32 %v1906_v47, %v1898_v14 }
0x2665   :  { %2644 = vtanh.f32 %v1908_v50 }
0x266f   :  { %v2645_v51 = vpop.eup %2644 }
0x2670   :  { %1911 = vrot.lane.b32.xlu0 %v2645_v51, %s2657_s5 }
0x26e2   :  { %v1912_v48 = vpop.permute.xlu0 %1911 }
0x26e3   :  { %v1914_v5 = vmul.f32 %v1912_v48, %v1897_v43 }
0x26e5   :  { %1917 = vrot.lane.b32.xlu1 %v1914_v5, %s2658_s25 }
0x2757   :  { %v1918_v54 = vpop.permute.xlu1 %1917 }
0x2758   :  { %2410 = vmatmul.mubr.msk.f32.vlgmr.msra.gmra.mrb[18].mxu1 %vm199_vm5, %v1918_v54 }
0x282b   :  { %v1987_v56 = vpop.f32.mrb[18].mxu1 }
0x282c   :  { %v1991_v57 = vadd.f32 %v1987_v56, %v1191_v55  ;;  %v2411_v58 = vpop.f32.mrb[19].mxu1 }
0x282e   :  { %v2095_v59 = vmul.f32 -1.442695, %v1991_v57 }
0x2830   :  { %2646 = vpow2.f32 %v2095_v59 }
0x2831   :  { %2648 = vtanh.f32 %v1991_v57 }
0x283a   :  { %v2647_v60 = vpop.eup %2646 }
0x283b   :  { %v1996_v61 = vadd.f32 1.0, %v2647_v60  ;;  %v2649_v62 = vpop.eup %2648 }
0x283d   :  { %2650 = vrcp.f32 %v1996_v61 }
0x2847   :  { %v2651_v63 = vpop.eup %2650 }
0x2848   :  { %v1999_v6 = vsel %vm2765_vm4, %v2649_v62, %v2651_v63 }
0x2849   :  { %2002 = vrot.lane.b32.xlu0 %v1999_v6, %s2657_s5  ;;  %v2000_v11 = vmul.f32 %v1999_v6, %v1908_v50 }
0x28bb   :  { %v2003_v46 = vpop.permute.xlu0 %2002 }
0x28bc   :  { %v2005_v7 = vmul.f32 %v2003_v46, %v1999_v6 }
0x28be   :  { %2007 = vrot.lane.b32.xlu1 %v2005_v7, %s2658_s25 }
0x28c2   :  { %2023 = vrot.lane.b32.xlu1 %v2096_v19, %s2659_s11 }
0x2930   :  { %v2008_v10 = vpop.permute.xlu1 %2007 }
0x2931   :  { %v2010_v15 = vadd.f32 %v2008_v10, %v2000_v11 }
0x2933   :  { %2652 = vtanh.f32 %v2010_v15 }
0x2934   :  { %v2024_v53 = vpop.permute.xlu1 %2023 }
0x293d   :  { %v2653_v16 = vpop.eup %2652 }
0x293e   :  { %2013 = vrot.lane.b32.xlu0 %v2653_v16, %s2657_s5 }
0x29b0   :  { %v2014_v17 = vpop.permute.xlu0 %2013 }
0x29b1   :  { %v2016_v18 = vmul.f32 %v2014_v17, %v1999_v6 }
0x29b3   :  { %v2026_v8 = vmul.f32 %v2024_v53, %v2016_v18 }
0x29b5   :  { %2028 = vrot.lane.b32.xlu0 %v2026_v8, %s2658_s25 }
0x2a27   :  { %v2029_v20 = vpop.permute.xlu0 %2028 }
0x2a28   :  { %v2031_v12 = vsel %vm199_vm5, %v2029_v20, 0.0 }
0x2a29   :  { %2032 = vadd.xlane.f32.xlu1 %v2031_v12 }
0x2ab6   :  { %v2033_v1 = vpop.xlane.xlu1 %2032 }
0x2ab7   :  { %v2041_v22 = vadd.f32 %v2097_v21, %v2033_v1 }
0x2ab9   :  { %2043 = vst.msk [vmem:[%s3102_s9] sm:$0xff] %vm2042_vm6, %v2041_v22 }

</bundles_post_ra>
